<compile_context>
chip_gen: v7x
topology: tpu7x:2x2x1
jax: 0.10.0
libtpu: 0.0.40
codegen_flags: <defaults>
</compile_context>

<pallas_src>
import jax
import jax.numpy as jnp
from jax.experimental import pallas as pl
from jax.experimental.pallas import tpu as pltpu


# ----------------------------- Pallas kernels -----------------------------

def _qkv_proj_kernel(x_ref, wt_ref, b_ref, q_ref, k_ref, v_ref):
    # (3O, C) @ (C, bm) on the MXU (bf16 operands, f32 accumulate) + f32 bias.
    acc = jnp.dot(wt_ref[...], x_ref[0],
                  preferred_element_type=jnp.float32) + b_ref[...]
    o = q_ref.shape[1]
    # Channel split = cheap sublane-aligned slices (O is a multiple of 8).
    q_ref[0] = acc[:o].astype(q_ref.dtype)
    k_ref[0] = acc[o:2 * o].astype(k_ref.dtype)
    v_ref[0] = acc[2 * o:].astype(v_ref.dtype)


def qkv_project(x_cm, w_t, b2, out_planes, *, block_m=512):
    """Fused 1x1-conv q/k/v projection.

    x_cm (B, C, H*W) bf16 channel-major; w_t (3O, C) bf16; b2 (3O, 1) f32.
    Returns three (B, O, H*W) bf16 arrays (channel-major -> no transposes).
    """
    B, C, HW = x_cm.shape
    threeO = w_t.shape[0]
    bm = min(block_m, HW) if HW % 128 == 0 else HW
    out_sd = jax.ShapeDtypeStruct((B, out_planes, HW), jnp.bfloat16)
    return pl.pallas_call(
        _qkv_proj_kernel,
        out_shape=(out_sd, out_sd, out_sd),
        grid=(B, pl.cdiv(HW, bm)),
        in_specs=[
            pl.BlockSpec((1, C, bm), lambda b, m: (b, 0, m)),
            pl.BlockSpec((threeO, C), lambda b, m: (0, 0)),
            pl.BlockSpec((threeO, 1), lambda b, m: (0, 0)),
        ],
        out_specs=(
            pl.BlockSpec((1, out_planes, bm), lambda b, m: (b, 0, m)),
            pl.BlockSpec((1, out_planes, bm), lambda b, m: (b, 0, m)),
            pl.BlockSpec((1, out_planes, bm), lambda b, m: (b, 0, m)),
        ),
        compiler_params=pltpu.CompilerParams(
            dimension_semantics=("parallel", "parallel"),
            vmem_limit_bytes=32 * 1024 * 1024),
    )(x_cm, w_t, b2)


def _make_attn_kernel(kernel_att, Wp, Lq):
    def kernel(q_ref, k_ref, v_ref, peq_ref, pep_ref, o_ref):
        # bf16 DMA, f32 compute (portable across v5e/v6e/v7x).
        q = q_ref[...].astype(jnp.float32)           # (G, D, Lq)  Lq = Ho*Wp
        k = k_ref[...].astype(jnp.float32)           # (G, D, Lp)
        peq = peq_ref[...]                           # (D, Lq) f32
        pep = pep_ref[...]                           # (D, Lp) f32

        # Window-independent positional term: sum_d q * pe_q.
        qpe = jnp.sum(q * peq[None], axis=1, keepdims=True)      # (G, 1, Lq)

        # Logits per window; each window of the halo-padded, row-major
        # flattened keys is a single static lane-offset slice.
        logit_list = []
        for ki in range(kernel_att):
            for kj in range(kernel_att):
                off = ki * Wp + kj
                kw = k[:, :, off:off + Lq]                        # (G, D, Lq)
                pw = pep[:, off:off + Lq]                         # (D, Lq)
                logit_list.append(
                    jnp.sum(q * (kw - pw[None]), axis=1, keepdims=True))
        logits = jnp.concatenate(logit_list, axis=1) + qpe       # (G, KK, Lq)

        # Softmax over the window; normalization deferred to ONE reciprocal.
        m = jnp.max(logits, axis=1, keepdims=True)                # (G, 1, Lq)
        p = jnp.exp(logits - m)                                   # (G, KK, Lq)
        inv = pl.reciprocal(jnp.sum(p, axis=1, keepdims=True),
                            approx=True)                          # EUP slot

        # Un-normalized weighted sum of windowed values, normalize once.
        v = v_ref[...].astype(jnp.float32)                        # (G, D, Lp)
        acc = jnp.zeros(q.shape, jnp.float32)
        idx = 0
        for ki in range(kernel_att):
            for kj in range(kernel_att):
                off = ki * Wp + kj
                acc = acc + p[:, idx:idx + 1, :] * v[:, :, off:off + Lq]
                idx += 1
        o_ref[...] = (acc * inv).astype(o_ref.dtype)

    return kernel


def local_attention(qf, kf, vf, peq, pep, *, kernel_att, Wp, group=2):
    """qf (BH,D,Lq) bf16; kf/vf (BH,D,Lp) bf16; peq (D,Lq) f32; pep (D,Lp) f32."""
    BH, D, Lq = qf.shape
    Lp = kf.shape[-1]
    G = group if (group <= BH and BH % group == 0) else 1
    kern = _make_attn_kernel(kernel_att, Wp, Lq)
    return pl.pallas_call(
        kern,
        out_shape=jax.ShapeDtypeStruct((BH, D, Lq), jnp.float32),
        grid=(BH // G,),
        in_specs=[
            pl.BlockSpec((G, D, Lq), lambda i: (i, 0, 0)),
            pl.BlockSpec((G, D, Lp), lambda i: (i, 0, 0)),
            pl.BlockSpec((G, D, Lp), lambda i: (i, 0, 0)),
            pl.BlockSpec((D, Lq), lambda i: (0, 0)),   # bh-invariant
            pl.BlockSpec((D, Lp), lambda i: (0, 0)),   # bh-invariant
        ],
        out_specs=pl.BlockSpec((G, D, Lq), lambda i: (i, 0, 0)),
        compiler_params=pltpu.CompilerParams(
            dimension_semantics=("parallel",),
            vmem_limit_bytes=32 * 1024 * 1024),
    )(qf, kf, vf, peq, pep)


# ----------------------------- JAX glue -----------------------------------

def position(H, W, dtype=jnp.float32):
    loc_w = jnp.tile(jnp.linspace(-1.0, 1.0, W, dtype=dtype)[None, :], (H, 1))
    loc_h = jnp.tile(jnp.linspace(-1.0, 1.0, H, dtype=dtype)[:, None], (1, W))
    return jnp.stack([loc_w, loc_h], axis=0)[None]            # (1, 2, H, W)


def init_params(key, in_planes, out_planes, head):
    D = out_planes // head
    ks = jax.random.split(key, 8)

    def w(k, shape, scale=0.1):
        return (scale * jax.random.normal(k, shape)).astype(jnp.float32)

    return dict(
        wq=w(ks[0], (in_planes, out_planes)), bq=w(ks[1], (out_planes,)),
        wk=w(ks[2], (in_planes, out_planes)), bk=w(ks[3], (out_planes,)),
        wv=w(ks[4], (in_planes, out_planes)), bv=w(ks[5], (out_planes,)),
        wp=w(ks[6], (2, D)),                  bp=w(ks[7], (D,)),
    )


def self_attention_forward(params, x, *, head, kernel_att, stride_, dilation):
    B, C, H, W = x.shape
    O = params["wq"].shape[1]
    D = O // head
    scale = D ** (-0.5)
    pad = (dilation * (kernel_att - 1) + 1) // 2
    BH = B * head

    if stride_ != 1:
        # TODO(synk): stride_>1 query subsampling is not implemented in the
        # lane-dense Pallas fast path; fall back to the pure-JAX unfold path.
        return reference_forward(params, x, head=head, kernel_att=kernel_att,
                                 stride_=stride_, dilation=dilation)

    # --- Fused q/k/v 1x1-conv projection (bf16 MXU); scale folded into wq.
    w_qkv_t = jnp.concatenate(
        [params["wq"] * scale, params["wk"], params["wv"]], axis=1
    ).T.astype(jnp.bfloat16)                                     # (3O, C)
    b_qkv = jnp.concatenate(
        [params["bq"] * scale, params["bk"], params["bv"]]).reshape(-1, 1)
    x_cm = x.reshape(B, C, H * W).astype(jnp.bfloat16)           # channel-major
    q_cm, k_cm, v_cm = qkv_project(x_cm, w_qkv_t, b_qkv, O)      # (B,O,HW) bf16

    q_img = q_cm.reshape(BH, D, H, W)
    k_img = k_cm.reshape(BH, D, H, W)
    v_img = v_cm.reshape(BH, D, H, W)

    # --- Positional encoding (tiny; plain XLA, no pallas_call overhead).
    pos = position(H, W)[0]                                      # (2, H, W)
    pe_img = (jnp.einsum("chw,cd->dhw", pos, params["wp"])
              + params["bp"][:, None, None])                     # (D, H, W) f32

    Hp, Wp = H + 2 * pad, W + 2 * pad
    Ho = Hp - kernel_att + 1
    Wo = Wp - kernel_att + 1
    Lq = Ho * Wp
    tail = kernel_att - 1  # flattened-axis slack so the last window slice fits
    # TODO(synk): dilation only affects the pad (windows sample consecutive
    # offsets); a dilated unfold is not implemented (shared with the reference).

    def flat_q(t):
        # (..., H, W) -> zero-pad width Wo->Wp, flatten to (..., Ho*Wp).
        t = t[..., :Ho, :Wo]
        t = jnp.pad(t, [(0, 0)] * (t.ndim - 1) + [(0, Wp - Wo)])
        return t.reshape(*t.shape[:-2], Lq)

    def flat_halo(t):
        # (..., H, W) -> reflection halo, flatten, add `tail` zeros of slack.
        t = jnp.pad(t, [(0, 0)] * (t.ndim - 2) + [(pad, pad), (pad, pad)],
                    mode="reflect")
        t = t.reshape(*t.shape[:-2], Hp * Wp)
        return jnp.pad(t, [(0, 0)] * (t.ndim - 1) + [(0, tail)])

    qf = flat_q(q_img)                                           # (BH,D,Lq) bf16
    kf = flat_halo(k_img)                                        # (BH,D,Lp) bf16
    vf = flat_halo(v_img)
    peq = flat_q(pe_img)                                         # (D,Lq) f32
    pep = flat_halo(pe_img)                                      # (D,Lp) f32

    out = local_attention(qf, kf, vf, peq, pep,
                          kernel_att=kernel_att, Wp=Wp)          # (BH,D,Lq) f32
    out = out.reshape(BH, D, Ho, Wp)[..., :Wo]                   # drop pad cols
    return out.reshape(B, head * D, Ho, Wo)


# ----------------------------- pure-JAX reference --------------------------

def _unfold_nchw(x, ka, stride_, pad):
    xp = jnp.pad(x, ((0, 0), (0, 0), (pad, pad), (pad, pad)), mode="reflect")
    N, C, Hp, Wp = xp.shape
    Ho = (Hp - ka) // stride_ + 1
    Wo = (Wp - ka) // stride_ + 1
    patches = []
    for ki in range(ka):
        for kj in range(ka):
            patches.append(
                xp[:, :,
                   ki:ki + stride_ * (Ho - 1) + 1:stride_,
                   kj:kj + stride_ * (Wo - 1) + 1:stride_])
    u = jnp.stack(patches, axis=2)
    return u.reshape(N, C, ka * ka, Ho * Wo), Ho, Wo


def reference_forward(params, x, *, head, kernel_att, stride_, dilation):
    B, C, H, W = x.shape
    out_planes = params["wq"].shape[1]
    D = out_planes // head
    scale = D ** (-0.5)
    pad = (dilation * (kernel_att - 1) + 1) // 2
    BH = B * head

    x_pix = jnp.transpose(x, (0, 2, 3, 1)).reshape(B * H * W, C)
    q = x_pix @ params["wq"] + params["bq"]
    k = x_pix @ params["wk"] + params["bk"]
    v = x_pix @ params["wv"] + params["bv"]

    def to_img(t):
        return jnp.transpose(t.reshape(B, H, W, out_planes), (0, 3, 1, 2))

    q_img = to_img(q).reshape(BH, D, H, W) * scale
    k_img = to_img(k).reshape(BH, D, H, W)
    v_img = to_img(v).reshape(BH, D, H, W)

    pos = position(H, W)
    pos_pix = jnp.transpose(pos, (0, 2, 3, 1)).reshape(H * W, 2)
    pe = pos_pix @ params["wp"] + params["bp"]
    pe_img = jnp.transpose(pe.reshape(1, H, W, D), (0, 3, 1, 2))

    if stride_ > 1:
        q_img = q_img[:, :, ::stride_, ::stride_]
        pe_q_img = pe_img[:, :, ::stride_, ::stride_]
    else:
        pe_q_img = pe_img

    k_unf, Ho, Wo = _unfold_nchw(k_img, kernel_att, stride_, pad)
    v_unf, _, _ = _unfold_nchw(v_img, kernel_att, stride_, pad)
    pe_unf, _, _ = _unfold_nchw(pe_img, kernel_att, stride_, pad)

    L = Ho * Wo
    q_seq = jnp.transpose(q_img.reshape(BH, D, L), (0, 2, 1))
    k_seq = jnp.transpose(k_unf, (0, 3, 2, 1))
    v_seq = jnp.transpose(v_unf, (0, 3, 2, 1))
    peq = jnp.transpose(pe_q_img.reshape(1, D, L), (0, 2, 1))[0]
    peu = jnp.transpose(pe_unf, (0, 3, 2, 1))[0]

    keys = k_seq + peq[None, :, None, :] - peu[None]
    att = jnp.einsum("bld,blkd->blk", q_seq, keys)
    att = jax.nn.softmax(att, axis=-1)
    out = jnp.einsum("blk,blkd->bld", att, v_seq)
    return jnp.transpose(out, (0, 2, 1)).reshape(B, head * D, Ho, Wo)


if __name__ == "__main__":
    B, C, H, W = 2, 4, 16, 16
    out_planes, head, kernel_att, stride_, dilation = 32, 4, 3, 1, 1

    key = jax.random.PRNGKey(0)
    kx, kp = jax.random.split(key)
    x = jax.random.normal(kx, (B, C, H, W), dtype=jnp.float32)
    params = init_params(kp, C, out_planes, head)

    fwd = jax.jit(self_attention_forward,
                  static_argnames=("head", "kernel_att", "stride_", "dilation"))
    out = fwd(params, x, head=head, kernel_att=kernel_att,
              stride_=stride_, dilation=dilation)
    out = jax.block_until_ready(out)

    assert out.shape == (B, out_planes, H, W), out.shape
    assert bool(jnp.all(jnp.isfinite(out)))

    ref = reference_forward(params, x, head=head, kernel_att=kernel_att,
                            stride_=stride_, dilation=dilation)
    max_err = float(jnp.max(jnp.abs(out - ref)))
    # bf16 operands in the Pallas path -> slightly looser atol than pure f32.
    assert bool(jnp.allclose(out, ref, rtol=5e-2, atol=1e-2)), max_err
    print("KERNEL_OK")
</pallas_src>

<mosaic_0001>
module attributes {stable_mosaic.version = 11 : i64} {
  func.func @_qkv_proj_kernel(%arg0: i32, %arg1: i32, %arg2: memref<1x4x256xbf16, #tpu.memory_space<vmem>>, %arg3: memref<96x4xbf16, #tpu.memory_space<vmem>>, %arg4: memref<96x1xf32, #tpu.memory_space<vmem>>, %arg5: memref<1x32x256xbf16, #tpu.memory_space<vmem>>, %arg6: memref<1x32x256xbf16, #tpu.memory_space<vmem>>, %arg7: memref<1x32x256xbf16, #tpu.memory_space<vmem>>) attributes {dimension_semantics = [#tpu.dimension_semantics<parallel>, #tpu.dimension_semantics<parallel>], iteration_bounds = array<i64: 2, 1>, scalar_prefetch = 0 : i64, scratch_operands = 0 : i64, tpu.core_type = #tpu.core_type<tc>, window_params = [{transform_indices = @transform_0, window_bounds = array<i64: 1, 4, 256>}, {pipeline_mode = #tpu.pipeline_mode<synchronous>, transform_indices = @transform_1, window_bounds = array<i64: 96, 4>}, {pipeline_mode = #tpu.pipeline_mode<synchronous>, transform_indices = @transform_2, window_bounds = array<i64: 96, 1>}, {transform_indices = @transform_3, window_bounds = array<i64: 1, 32, 256>}, {transform_indices = @transform_4, window_bounds = array<i64: 1, 32, 256>}, {transform_indices = @transform_5, window_bounds = array<i64: 1, 32, 256>}]} {
    %c0 = arith.constant 0 : index
    %c0_0 = arith.constant 0 : index
    %0 = vector.load %arg3[%c0, %c0_0] : memref<96x4xbf16, #tpu.memory_space<vmem>>, vector<96x4xbf16>
    %c0_1 = arith.constant 0 : index
    %c0_2 = arith.constant 0 : index
    %c0_3 = arith.constant 0 : index
    %1 = vector.load %arg2[%c0_1, %c0_2, %c0_3] : memref<1x4x256xbf16, #tpu.memory_space<vmem>>, vector<1x4x256xbf16>
    %2 = vector.shape_cast %1 : vector<1x4x256xbf16> to vector<4x256xbf16>
    %cst = arith.constant dense<0.000000e+00> : vector<96x256xf32>
    %3 = tpu.matmul %0, %2, %cst {dimension_numbers = #tpu.dot_dimension_numbers<[1], [0], [0], [1], [0, 0, 1, 1], [], []>} : vector<96x4xbf16>, vector<4x256xbf16>, vector<96x256xf32> -> vector<96x256xf32>
    %c0_4 = arith.constant 0 : index
    %c0_5 = arith.constant 0 : index
    %4 = vector.load %arg4[%c0_4, %c0_5] : memref<96x1xf32, #tpu.memory_space<vmem>>, vector<96x1xf32>
    %5 = vector.broadcast %4 : vector<96x1xf32> to vector<96x256xf32>
    %6 = arith.addf %3, %5 : vector<96x256xf32>
    %7 = vector.extract_strided_slice %6 {offsets = [0, 0], sizes = [32, 256], strides = [1, 1]} : vector<96x256xf32> to vector<32x256xf32>
    %8 = arith.truncf %7 : vector<32x256xf32> to vector<32x256xbf16>
    %c0_6 = arith.constant 0 : index
    %c0_7 = arith.constant 0 : index
    %c0_8 = arith.constant 0 : index
    %9 = vector.load %arg5[%c0_6, %c0_7, %c0_8] : memref<1x32x256xbf16, #tpu.memory_space<vmem>>, vector<1x32x256xbf16>
    %10 = vector.shape_cast %9 : vector<1x32x256xbf16> to vector<32x256xbf16>
    %11 = vector.shape_cast %8 : vector<32x256xbf16> to vector<1x32x256xbf16>
    tpu.vector_store %arg5[%c0_6, %c0_7, %c0_8], %11 {strides = array<i32>} : memref<1x32x256xbf16, #tpu.memory_space<vmem>>, vector<1x32x256xbf16>,
    %12 = vector.extract_strided_slice %6 {offsets = [32, 0], sizes = [32, 256], strides = [1, 1]} : vector<96x256xf32> to vector<32x256xf32>
    %13 = arith.truncf %12 : vector<32x256xf32> to vector<32x256xbf16>
    %c0_9 = arith.constant 0 : index
    %c0_10 = arith.constant 0 : index
    %c0_11 = arith.constant 0 : index
    %14 = vector.load %arg6[%c0_9, %c0_10, %c0_11] : memref<1x32x256xbf16, #tpu.memory_space<vmem>>, vector<1x32x256xbf16>
    %15 = vector.shape_cast %14 : vector<1x32x256xbf16> to vector<32x256xbf16>
    %16 = vector.shape_cast %13 : vector<32x256xbf16> to vector<1x32x256xbf16>
    tpu.vector_store %arg6[%c0_9, %c0_10, %c0_11], %16 {strides = array<i32>} : memref<1x32x256xbf16, #tpu.memory_space<vmem>>, vector<1x32x256xbf16>,
    %17 = vector.extract_strided_slice %6 {offsets = [64, 0], sizes = [32, 256], strides = [1, 1]} : vector<96x256xf32> to vector<32x256xf32>
    %18 = arith.truncf %17 : vector<32x256xf32> to vector<32x256xbf16>
    %c0_12 = arith.constant 0 : index
    %c0_13 = arith.constant 0 : index
    %c0_14 = arith.constant 0 : index
    %19 = vector.load %arg7[%c0_12, %c0_13, %c0_14] : memref<1x32x256xbf16, #tpu.memory_space<vmem>>, vector<1x32x256xbf16>
    %20 = vector.shape_cast %19 : vector<1x32x256xbf16> to vector<32x256xbf16>
    %21 = vector.shape_cast %18 : vector<32x256xbf16> to vector<1x32x256xbf16>
    tpu.vector_store %arg7[%c0_12, %c0_13, %c0_14], %21 {strides = array<i32>} : memref<1x32x256xbf16, #tpu.memory_space<vmem>>, vector<1x32x256xbf16>,
    return
  }
  func.func @transform_0(%arg0: i32, %arg1: i32) -> (i32, i32, i32) {
    %c0_i32 = arith.constant 0 : i32
    %c0_i32_0 = arith.constant 0 : i32
    return %arg0, %c0_i32, %arg1 : i32, i32, i32
  }
  func.func @transform_1(%arg0: i32, %arg1: i32) -> (i32, i32) {
    %c0_i32 = arith.constant 0 : i32
    %c0_i32_0 = arith.constant 0 : i32
    %c0_i32_1 = arith.constant 0 : i32
    return %c0_i32, %c0_i32_0 : i32, i32
  }
  func.func @transform_2(%arg0: i32, %arg1: i32) -> (i32, i32) {
    %c0_i32 = arith.constant 0 : i32
    %c0_i32_0 = arith.constant 0 : i32
    %c0_i32_1 = arith.constant 0 : i32
    return %c0_i32, %c0_i32_0 : i32, i32
  }
  func.func @transform_3(%arg0: i32, %arg1: i32) -> (i32, i32, i32) {
    %c0_i32 = arith.constant 0 : i32
    %c0_i32_0 = arith.constant 0 : i32
    return %arg0, %c0_i32, %arg1 : i32, i32, i32
  }
  func.func @transform_4(%arg0: i32, %arg1: i32) -> (i32, i32, i32) {
    %c0_i32 = arith.constant 0 : i32
    %c0_i32_0 = arith.constant 0 : i32
    return %arg0, %c0_i32, %arg1 : i32, i32, i32
  }
  func.func @transform_5(%arg0: i32, %arg1: i32) -> (i32, i32, i32) {
    %c0_i32 = arith.constant 0 : i32
    %c0_i32_0 = arith.constant 0 : i32
    return %arg0, %c0_i32, %arg1 : i32, i32, i32
  }
}

module attributes {stable_mosaic.version = 11 : i64} {
  func.func @kernel(%arg0: i32, %arg1: memref<2x8x288xbf16, #tpu.memory_space<vmem>>, %arg2: memref<2x8x326xbf16, #tpu.memory_space<vmem>>, %arg3: memref<2x8x326xbf16, #tpu.memory_space<vmem>>, %arg4: memref<8x288xf32, #tpu.memory_space<vmem>>, %arg5: memref<8x326xf32, #tpu.memory_space<vmem>>, %arg6: memref<2x8x288xf32, #tpu.memory_space<vmem>>) attributes {dimension_semantics = [#tpu.dimension_semantics<parallel>], iteration_bounds = array<i64: 4>, scalar_prefetch = 0 : i64, scratch_operands = 0 : i64, tpu.core_type = #tpu.core_type<tc>, window_params = [{transform_indices = @transform_0, window_bounds = array<i64: 2, 8, 288>}, {transform_indices = @transform_1, window_bounds = array<i64: 2, 8, 326>}, {transform_indices = @transform_2, window_bounds = array<i64: 2, 8, 326>}, {pipeline_mode = #tpu.pipeline_mode<synchronous>, transform_indices = @transform_3, window_bounds = array<i64: 8, 288>}, {pipeline_mode = #tpu.pipeline_mode<synchronous>, transform_indices = @transform_4, window_bounds = array<i64: 8, 326>}, {transform_indices = @transform_5, window_bounds = array<i64: 2, 8, 288>}]} {
    %c0 = arith.constant 0 : index
    %c0_0 = arith.constant 0 : index
    %c0_1 = arith.constant 0 : index
    %0 = vector.load %arg1[%c0, %c0_0, %c0_1] : memref<2x8x288xbf16, #tpu.memory_space<vmem>>, vector<2x8x288xbf16>
    %1 = arith.extf %0 : vector<2x8x288xbf16> to vector<2x8x288xf32>
    %c0_2 = arith.constant 0 : index
    %c0_3 = arith.constant 0 : index
    %c0_4 = arith.constant 0 : index
    %2 = vector.load %arg2[%c0_2, %c0_3, %c0_4] : memref<2x8x326xbf16, #tpu.memory_space<vmem>>, vector<2x8x326xbf16>
    %3 = arith.extf %2 : vector<2x8x326xbf16> to vector<2x8x326xf32>
    %c0_5 = arith.constant 0 : index
    %c0_6 = arith.constant 0 : index
    %4 = vector.load %arg4[%c0_5, %c0_6] : memref<8x288xf32, #tpu.memory_space<vmem>>, vector<8x288xf32>
    %c0_7 = arith.constant 0 : index
    %c0_8 = arith.constant 0 : index
    %5 = vector.load %arg5[%c0_7, %c0_8] : memref<8x326xf32, #tpu.memory_space<vmem>>, vector<8x326xf32>
    %6 = vector.shape_cast %4 : vector<8x288xf32> to vector<1x8x288xf32>
    %7 = vector.broadcast %6 : vector<1x8x288xf32> to vector<2x8x288xf32>
    %8 = arith.mulf %1, %7 : vector<2x8x288xf32>
    %cst = arith.constant dense<0.000000e+00> : vector<2x288xf32>
    %9 = vector.multi_reduction <add>, %8, %cst [1] : vector<2x8x288xf32> to vector<2x288xf32>
    %10 = vector.shape_cast %9 : vector<2x288xf32> to vector<2x1x288xf32>
    %11 = vector.extract_strided_slice %3 {offsets = [0, 0, 0], sizes = [2, 8, 288], strides = [1, 1, 1]} : vector<2x8x326xf32> to vector<2x8x288xf32>
    %12 = vector.extract_strided_slice %5 {offsets = [0, 0], sizes = [8, 288], strides = [1, 1]} : vector<8x326xf32> to vector<8x288xf32>
    %13 = vector.shape_cast %12 : vector<8x288xf32> to vector<1x8x288xf32>
    %14 = vector.broadcast %13 : vector<1x8x288xf32> to vector<2x8x288xf32>
    %15 = arith.subf %11, %14 : vector<2x8x288xf32>
    %16 = arith.mulf %1, %15 : vector<2x8x288xf32>
    %cst_9 = arith.constant dense<0.000000e+00> : vector<2x288xf32>
    %17 = vector.multi_reduction <add>, %16, %cst_9 [1] : vector<2x8x288xf32> to vector<2x288xf32>
    %18 = vector.shape_cast %17 : vector<2x288xf32> to vector<2x1x288xf32>
    %19 = vector.extract_strided_slice %3 {offsets = [0, 0, 1], sizes = [2, 8, 288], strides = [1, 1, 1]} : vector<2x8x326xf32> to vector<2x8x288xf32>
    %20 = vector.extract_strided_slice %5 {offsets = [0, 1], sizes = [8, 288], strides = [1, 1]} : vector<8x326xf32> to vector<8x288xf32>
    %21 = vector.shape_cast %20 : vector<8x288xf32> to vector<1x8x288xf32>
    %22 = vector.broadcast %21 : vector<1x8x288xf32> to vector<2x8x288xf32>
    %23 = arith.subf %19, %22 : vector<2x8x288xf32>
    %24 = arith.mulf %1, %23 : vector<2x8x288xf32>
    %cst_10 = arith.constant dense<0.000000e+00> : vector<2x288xf32>
    %25 = vector.multi_reduction <add>, %24, %cst_10 [1] : vector<2x8x288xf32> to vector<2x288xf32>
    %26 = vector.shape_cast %25 : vector<2x288xf32> to vector<2x1x288xf32>
    %27 = vector.extract_strided_slice %3 {offsets = [0, 0, 2], sizes = [2, 8, 288], strides = [1, 1, 1]} : vector<2x8x326xf32> to vector<2x8x288xf32>
    %28 = vector.extract_strided_slice %5 {offsets = [0, 2], sizes = [8, 288], strides = [1, 1]} : vector<8x326xf32> to vector<8x288xf32>
    %29 = vector.shape_cast %28 : vector<8x288xf32> to vector<1x8x288xf32>
    %30 = vector.broadcast %29 : vector<1x8x288xf32> to vector<2x8x288xf32>
    %31 = arith.subf %27, %30 : vector<2x8x288xf32>
    %32 = arith.mulf %1, %31 : vector<2x8x288xf32>
    %cst_11 = arith.constant dense<0.000000e+00> : vector<2x288xf32>
    %33 = vector.multi_reduction <add>, %32, %cst_11 [1] : vector<2x8x288xf32> to vector<2x288xf32>
    %34 = vector.shape_cast %33 : vector<2x288xf32> to vector<2x1x288xf32>
    %35 = vector.extract_strided_slice %3 {offsets = [0, 0, 18], sizes = [2, 8, 288], strides = [1, 1, 1]} : vector<2x8x326xf32> to vector<2x8x288xf32>
    %36 = vector.extract_strided_slice %5 {offsets = [0, 18], sizes = [8, 288], strides = [1, 1]} : vector<8x326xf32> to vector<8x288xf32>
    %37 = vector.shape_cast %36 : vector<8x288xf32> to vector<1x8x288xf32>
    %38 = vector.broadcast %37 : vector<1x8x288xf32> to vector<2x8x288xf32>
    %39 = arith.subf %35, %38 : vector<2x8x288xf32>
    %40 = arith.mulf %1, %39 : vector<2x8x288xf32>
    %cst_12 = arith.constant dense<0.000000e+00> : vector<2x288xf32>
    %41 = vector.multi_reduction <add>, %40, %cst_12 [1] : vector<2x8x288xf32> to vector<2x288xf32>
    %42 = vector.shape_cast %41 : vector<2x288xf32> to vector<2x1x288xf32>
    %43 = vector.extract_strided_slice %3 {offsets = [0, 0, 19], sizes = [2, 8, 288], strides = [1, 1, 1]} : vector<2x8x326xf32> to vector<2x8x288xf32>
    %44 = vector.extract_strided_slice %5 {offsets = [0, 19], sizes = [8, 288], strides = [1, 1]} : vector<8x326xf32> to vector<8x288xf32>
    %45 = vector.shape_cast %44 : vector<8x288xf32> to vector<1x8x288xf32>
    %46 = vector.broadcast %45 : vector<1x8x288xf32> to vector<2x8x288xf32>
    %47 = arith.subf %43, %46 : vector<2x8x288xf32>
    %48 = arith.mulf %1, %47 : vector<2x8x288xf32>
    %cst_13 = arith.constant dense<0.000000e+00> : vector<2x288xf32>
    %49 = vector.multi_reduction <add>, %48, %cst_13 [1] : vector<2x8x288xf32> to vector<2x288xf32>
    %50 = vector.shape_cast %49 : vector<2x288xf32> to vector<2x1x288xf32>
    %51 = vector.extract_strided_slice %3 {offsets = [0, 0, 20], sizes = [2, 8, 288], strides = [1, 1, 1]} : vector<2x8x326xf32> to vector<2x8x288xf32>
    %52 = vector.extract_strided_slice %5 {offsets = [0, 20], sizes = [8, 288], strides = [1, 1]} : vector<8x326xf32> to vector<8x288xf32>
    %53 = vector.shape_cast %52 : vector<8x288xf32> to vector<1x8x288xf32>
    %54 = vector.broadcast %53 : vector<1x8x288xf32> to vector<2x8x288xf32>
    %55 = arith.subf %51, %54 : vector<2x8x288xf32>
    %56 = arith.mulf %1, %55 : vector<2x8x288xf32>
    %cst_14 = arith.constant dense<0.000000e+00> : vector<2x288xf32>
    %57 = vector.multi_reduction <add>, %56, %cst_14 [1] : vector<2x8x288xf32> to vector<2x288xf32>
    %58 = vector.shape_cast %57 : vector<2x288xf32> to vector<2x1x288xf32>
    %59 = vector.extract_strided_slice %3 {offsets = [0, 0, 36], sizes = [2, 8, 288], strides = [1, 1, 1]} : vector<2x8x326xf32> to vector<2x8x288xf32>
    %60 = vector.extract_strided_slice %5 {offsets = [0, 36], sizes = [8, 288], strides = [1, 1]} : vector<8x326xf32> to vector<8x288xf32>
    %61 = vector.shape_cast %60 : vector<8x288xf32> to vector<1x8x288xf32>
    %62 = vector.broadcast %61 : vector<1x8x288xf32> to vector<2x8x288xf32>
    %63 = arith.subf %59, %62 : vector<2x8x288xf32>
    %64 = arith.mulf %1, %63 : vector<2x8x288xf32>
    %cst_15 = arith.constant dense<0.000000e+00> : vector<2x288xf32>
    %65 = vector.multi_reduction <add>, %64, %cst_15 [1] : vector<2x8x288xf32> to vector<2x288xf32>
    %66 = vector.shape_cast %65 : vector<2x288xf32> to vector<2x1x288xf32>
    %67 = vector.extract_strided_slice %3 {offsets = [0, 0, 37], sizes = [2, 8, 288], strides = [1, 1, 1]} : vector<2x8x326xf32> to vector<2x8x288xf32>
    %68 = vector.extract_strided_slice %5 {offsets = [0, 37], sizes = [8, 288], strides = [1, 1]} : vector<8x326xf32> to vector<8x288xf32>
    %69 = vector.shape_cast %68 : vector<8x288xf32> to vector<1x8x288xf32>
    %70 = vector.broadcast %69 : vector<1x8x288xf32> to vector<2x8x288xf32>
    %71 = arith.subf %67, %70 : vector<2x8x288xf32>
    %72 = arith.mulf %1, %71 : vector<2x8x288xf32>
    %cst_16 = arith.constant dense<0.000000e+00> : vector<2x288xf32>
    %73 = vector.multi_reduction <add>, %72, %cst_16 [1] : vector<2x8x288xf32> to vector<2x288xf32>
    %74 = vector.shape_cast %73 : vector<2x288xf32> to vector<2x1x288xf32>
    %75 = vector.extract_strided_slice %3 {offsets = [0, 0, 38], sizes = [2, 8, 288], strides = [1, 1, 1]} : vector<2x8x326xf32> to vector<2x8x288xf32>
    %76 = vector.extract_strided_slice %5 {offsets = [0, 38], sizes = [8, 288], strides = [1, 1]} : vector<8x326xf32> to vector<8x288xf32>
    %77 = vector.shape_cast %76 : vector<8x288xf32> to vector<1x8x288xf32>
    %78 = vector.broadcast %77 : vector<1x8x288xf32> to vector<2x8x288xf32>
    %79 = arith.subf %75, %78 : vector<2x8x288xf32>
    %80 = arith.mulf %1, %79 : vector<2x8x288xf32>
    %cst_17 = arith.constant dense<0.000000e+00> : vector<2x288xf32>
    %81 = vector.multi_reduction <add>, %80, %cst_17 [1] : vector<2x8x288xf32> to vector<2x288xf32>
    %82 = vector.shape_cast %81 : vector<2x288xf32> to vector<2x1x288xf32>
    %83 = tpu.concatenate %18, %26, %34, %42, %50, %58, %66, %74, %82 in 1 : vector<2x1x288xf32>, vector<2x1x288xf32>, vector<2x1x288xf32>, vector<2x1x288xf32>, vector<2x1x288xf32>, vector<2x1x288xf32>, vector<2x1x288xf32>, vector<2x1x288xf32>, vector<2x1x288xf32> -> vector<2x9x288xf32>
    %84 = vector.broadcast %10 : vector<2x1x288xf32> to vector<2x9x288xf32>
    %85 = arith.addf %83, %84 : vector<2x9x288xf32>
    %cst_18 = arith.constant dense<0xFF800000> : vector<2x288xf32>
    %86 = vector.multi_reduction <maximumf>, %85, %cst_18 [1] : vector<2x9x288xf32> to vector<2x288xf32>
    %87 = vector.shape_cast %86 : vector<2x288xf32> to vector<2x1x288xf32>
    %88 = vector.broadcast %87 : vector<2x1x288xf32> to vector<2x9x288xf32>
    %89 = arith.subf %85, %88 : vector<2x9x288xf32>
    %90 = math.exp %89 : vector<2x9x288xf32>
    %cst_19 = arith.constant dense<0.000000e+00> : vector<2x288xf32>
    %91 = vector.multi_reduction <add>, %90, %cst_19 [1] : vector<2x9x288xf32> to vector<2x288xf32>
    %92 = vector.shape_cast %91 : vector<2x288xf32> to vector<2x1x288xf32>
    %93 = tpu.reciprocal %92 {approx = true} : vector<2x1x288xf32> -> vector<2x1x288xf32>
    %c0_20 = arith.constant 0 : index
    %c0_21 = arith.constant 0 : index
    %c0_22 = arith.constant 0 : index
    %94 = vector.load %arg3[%c0_20, %c0_21, %c0_22] : memref<2x8x326xbf16, #tpu.memory_space<vmem>>, vector<2x8x326xbf16>
    %95 = arith.extf %94 : vector<2x8x326xbf16> to vector<2x8x326xf32>
    %cst_23 = arith.constant 0.000000e+00 : f32
    %96 = vector.broadcast %cst_23 : f32 to vector<2x8x288xf32>
    %97 = vector.extract_strided_slice %90 {offsets = [0, 0, 0], sizes = [2, 1, 288], strides = [1, 1, 1]} : vector<2x9x288xf32> to vector<2x1x288xf32>
    %98 = vector.extract_strided_slice %95 {offsets = [0, 0, 0], sizes = [2, 8, 288], strides = [1, 1, 1]} : vector<2x8x326xf32> to vector<2x8x288xf32>
    %99 = vector.broadcast %97 : vector<2x1x288xf32> to vector<2x8x288xf32>
    %100 = arith.mulf %99, %98 : vector<2x8x288xf32>
    %101 = arith.addf %96, %100 : vector<2x8x288xf32>
    %102 = vector.extract_strided_slice %90 {offsets = [0, 1, 0], sizes = [2, 1, 288], strides = [1, 1, 1]} : vector<2x9x288xf32> to vector<2x1x288xf32>
    %103 = vector.extract_strided_slice %95 {offsets = [0, 0, 1], sizes = [2, 8, 288], strides = [1, 1, 1]} : vector<2x8x326xf32> to vector<2x8x288xf32>
    %104 = vector.broadcast %102 : vector<2x1x288xf32> to vector<2x8x288xf32>
    %105 = arith.mulf %104, %103 : vector<2x8x288xf32>
    %106 = arith.addf %101, %105 : vector<2x8x288xf32>
    %107 = vector.extract_strided_slice %90 {offsets = [0, 2, 0], sizes = [2, 1, 288], strides = [1, 1, 1]} : vector<2x9x288xf32> to vector<2x1x288xf32>
    %108 = vector.extract_strided_slice %95 {offsets = [0, 0, 2], sizes = [2, 8, 288], strides = [1, 1, 1]} : vector<2x8x326xf32> to vector<2x8x288xf32>
    %109 = vector.broadcast %107 : vector<2x1x288xf32> to vector<2x8x288xf32>
    %110 = arith.mulf %109, %108 : vector<2x8x288xf32>
    %111 = arith.addf %106, %110 : vector<2x8x288xf32>
    %112 = vector.extract_strided_slice %90 {offsets = [0, 3, 0], sizes = [2, 1, 288], strides = [1, 1, 1]} : vector<2x9x288xf32> to vector<2x1x288xf32>
    %113 = vector.extract_strided_slice %95 {offsets = [0, 0, 18], sizes = [2, 8, 288], strides = [1, 1, 1]} : vector<2x8x326xf32> to vector<2x8x288xf32>
    %114 = vector.broadcast %112 : vector<2x1x288xf32> to vector<2x8x288xf32>
    %115 = arith.mulf %114, %113 : vector<2x8x288xf32>
    %116 = arith.addf %111, %115 : vector<2x8x288xf32>
    %117 = vector.extract_strided_slice %90 {offsets = [0, 4, 0], sizes = [2, 1, 288], strides = [1, 1, 1]} : vector<2x9x288xf32> to vector<2x1x288xf32>
    %118 = vector.extract_strided_slice %95 {offsets = [0, 0, 19], sizes = [2, 8, 288], strides = [1, 1, 1]} : vector<2x8x326xf32> to vector<2x8x288xf32>
    %119 = vector.broadcast %117 : vector<2x1x288xf32> to vector<2x8x288xf32>
    %120 = arith.mulf %119, %118 : vector<2x8x288xf32>
    %121 = arith.addf %116, %120 : vector<2x8x288xf32>
    %122 = vector.extract_strided_slice %90 {offsets = [0, 5, 0], sizes = [2, 1, 288], strides = [1, 1, 1]} : vector<2x9x288xf32> to vector<2x1x288xf32>
    %123 = vector.extract_strided_slice %95 {offsets = [0, 0, 20], sizes = [2, 8, 288], strides = [1, 1, 1]} : vector<2x8x326xf32> to vector<2x8x288xf32>
    %124 = vector.broadcast %122 : vector<2x1x288xf32> to vector<2x8x288xf32>
    %125 = arith.mulf %124, %123 : vector<2x8x288xf32>
    %126 = arith.addf %121, %125 : vector<2x8x288xf32>
    %127 = vector.extract_strided_slice %90 {offsets = [0, 6, 0], sizes = [2, 1, 288], strides = [1, 1, 1]} : vector<2x9x288xf32> to vector<2x1x288xf32>
    %128 = vector.extract_strided_slice %95 {offsets = [0, 0, 36], sizes = [2, 8, 288], strides = [1, 1, 1]} : vector<2x8x326xf32> to vector<2x8x288xf32>
    %129 = vector.broadcast %127 : vector<2x1x288xf32> to vector<2x8x288xf32>
    %130 = arith.mulf %129, %128 : vector<2x8x288xf32>
    %131 = arith.addf %126, %130 : vector<2x8x288xf32>
    %132 = vector.extract_strided_slice %90 {offsets = [0, 7, 0], sizes = [2, 1, 288], strides = [1, 1, 1]} : vector<2x9x288xf32> to vector<2x1x288xf32>
    %133 = vector.extract_strided_slice %95 {offsets = [0, 0, 37], sizes = [2, 8, 288], strides = [1, 1, 1]} : vector<2x8x326xf32> to vector<2x8x288xf32>
    %134 = vector.broadcast %132 : vector<2x1x288xf32> to vector<2x8x288xf32>
    %135 = arith.mulf %134, %133 : vector<2x8x288xf32>
    %136 = arith.addf %131, %135 : vector<2x8x288xf32>
    %137 = vector.extract_strided_slice %90 {offsets = [0, 8, 0], sizes = [2, 1, 288], strides = [1, 1, 1]} : vector<2x9x288xf32> to vector<2x1x288xf32>
    %138 = vector.extract_strided_slice %95 {offsets = [0, 0, 38], sizes = [2, 8, 288], strides = [1, 1, 1]} : vector<2x8x326xf32> to vector<2x8x288xf32>
    %139 = vector.broadcast %137 : vector<2x1x288xf32> to vector<2x8x288xf32>
    %140 = arith.mulf %139, %138 : vector<2x8x288xf32>
    %141 = arith.addf %136, %140 : vector<2x8x288xf32>
    %142 = vector.broadcast %93 : vector<2x1x288xf32> to vector<2x8x288xf32>
    %143 = arith.mulf %141, %142 : vector<2x8x288xf32>
    %c0_24 = arith.constant 0 : index
    %c0_25 = arith.constant 0 : index
    %c0_26 = arith.constant 0 : index
    %144 = vector.load %arg6[%c0_24, %c0_25, %c0_26] : memref<2x8x288xf32, #tpu.memory_space<vmem>>, vector<2x8x288xf32>
    tpu.vector_store %arg6[%c0_24, %c0_25, %c0_26], %143 {strides = array<i32>} : memref<2x8x288xf32, #tpu.memory_space<vmem>>, vector<2x8x288xf32>,
    return
  }
  func.func @transform_0(%arg0: i32) -> (i32, i32, i32) {
    %c0_i32 = arith.constant 0 : i32
    %c0_i32_0 = arith.constant 0 : i32
    %c0_i32_1 = arith.constant 0 : i32
    return %arg0, %c0_i32, %c0_i32_0 : i32, i32, i32
  }
  func.func @transform_1(%arg0: i32) -> (i32, i32, i32) {
    %c0_i32 = arith.constant 0 : i32
    %c0_i32_0 = arith.constant 0 : i32
    %c0_i32_1 = arith.constant 0 : i32
    return %arg0, %c0_i32, %c0_i32_0 : i32, i32, i32
  }
  func.func @transform_2(%arg0: i32) -> (i32, i32, i32) {
    %c0_i32 = arith.constant 0 : i32
    %c0_i32_0 = arith.constant 0 : i32
    %c0_i32_1 = arith.constant 0 : i32
    return %arg0, %c0_i32, %c0_i32_0 : i32, i32, i32
  }
  func.func @transform_3(%arg0: i32) -> (i32, i32) {
    %c0_i32 = arith.constant 0 : i32
    %c0_i32_0 = arith.constant 0 : i32
    %c0_i32_1 = arith.constant 0 : i32
    return %c0_i32, %c0_i32_0 : i32, i32
  }
  func.func @transform_4(%arg0: i32) -> (i32, i32) {
    %c0_i32 = arith.constant 0 : i32
    %c0_i32_0 = arith.constant 0 : i32
    %c0_i32_1 = arith.constant 0 : i32
    return %c0_i32, %c0_i32_0 : i32, i32
  }
  func.func @transform_5(%arg0: i32) -> (i32, i32, i32) {
    %c0_i32 = arith.constant 0 : i32
    %c0_i32_0 = arith.constant 0 : i32
    %c0_i32_1 = arith.constant 0 : i32
    return %arg0, %c0_i32, %c0_i32_0 : i32, i32, i32
  }
}

</mosaic_0001>

<bundles_post_ra>
// kernel: self_attention_forward.2
= control target key start
LH: loop header
LB: loop body
LE: loop exit
PB: predicated region body
PF: predicated region fallthrough
CT: control target
= control target key end

     0   :  { %s973_s18 = smov 0   ;;  %s975_s19 = smov 0   ;;  %s1107_s0 = inlined_call_operand.vmem [shape: bf16[2,4,256], index: 0, kind: input, shape index: {}]   ;;  %s1108_s1 = inlined_call_operand.vmem [shape: bf16[96,4], index: 1, kind: input, shape index: {}]   ;;  %s1109_s2 = inlined_call_operand.vmem [shape: f32[96,1], index: 2, kind: input, shape index: {}]   ;;  %s1110_s3 = inlined_call_operand.vmem [shape: bf16[2,32,256], index: 3, kind: output, shape index: {0}]   ;;  %s1111_s4 = inlined_call_operand.vmem [shape: bf16[2,32,256], index: 4, kind: output, shape index: {1}]   ;;  %s1112_s5 = inlined_call_operand.vmem [shape: bf16[2,32,256], index: 5, kind: output, shape index: {2}]  }
   0x1   :  { %s977_s20 = smov 0  }
   0x2 LB: > { %s28_s21 = sadd.s32 1, %s936_s19  ;;  %p830_p0 = scmp.ge.s32.totalorder %s940_s20, 1  ;;  %s940_s20 = sphi %s977_s20, %s16_s20   ;;  %s936_s19 = sphi %s975_s19, %s1114_s19   ;;  %s932_s18 = sphi %s973_s18, %s1113_s18  }
   0x3   : > { %p30_p1 = scmp.ge.s32.totalorder %s28_s21, 2  ;;  %p217_p2 = scmp.lt.s32.totalorder %s940_s20, 3 }
   0x5   : > { %s1116_s21 = smov (%p30_p1, %s28_s21), 0  ;;  %p218_p3 = pnand %p830_p0, %p217_p2 }
   0x6   : > { %p272_p4 = scmp.lt.s32.totalorder (!%p218_p3), %s932_s18, 1  ;;  %v942_v0 = vmov (!%p218_p3), 0   ;;  %vm455_vm0 = vcmask (!%p218_p3), 1041408   ;;  %v327_v2 = vld [vmem:[%s1109_s2 + $0x10] sm:$0xff] (!%p218_p3)  ;;  %v325_v5 = vld [vmem:[%s1109_s2] sm:$0xff] (!%p218_p3)  ;;  %v328_v6 = vld [vmem:[%s1109_s2 + $0x18] sm:$0xff] (!%p218_p3) }
   0x7   : > { %221 = sbr.rel (%p218_p3) target bundleno = 260 (0x104), region = 32  ;;  %494 = vmatprep.mubr.bf16.mxu0 (!%p218_p3), %v942_v0  ;;  %524 = vmatprep.mubr.bf16.mxu1 (!%p218_p3), %v942_v0  ;;  %v912_v7 = vld [vmem:[%s1108_s1] sm:$0xff] (!%p218_p3)   ;;  %v913_v8 = vld [vmem:[%s1108_s1 + $0x18] sm:$0xff] (!%p218_p3)   ;;  %v326_v9 = vld [vmem:[%s1109_s2 + $0x8] sm:$0xff] (!%p218_p3)  ;;  %vm436_vm1 = vcmask (!%p218_p3), 31744  }
   0x8   : > { %911 = vset.pattern.permute.xlu1 (!%p218_p3), %v942_v0  ;;  %910 = vset.pattern.permute.xlu0 (!%p218_p3), %v942_v0  ;;  %v330_v10 = vld [vmem:[%s1109_s2 + $0x28] sm:$0xff] (!%p218_p3)  ;;  %v329_v11 = vld [vmem:[%s1109_s2 + $0x20] sm:$0xff] (!%p218_p3)  ;;  %v332_v12 = vld [vmem:[%s1109_s2 + $0x38] sm:$0xff] (!%p218_p3) }
   0x9   : > { %349 = vperm.xlu1 (!%p218_p3), %911, %v327_v2   ;;  %339 = vperm.xlu0 (!%p218_p3), %910, %v325_v5   ;;  %v914_v13 = vld [vmem:[%s1108_s1 + $0x8] sm:$0xff] (!%p218_p3)   ;;  %v915_v14 = vld [vmem:[%s1108_s1 + $0x20] sm:$0xff] (!%p218_p3)   ;;  %v331_v15 = vld [vmem:[%s1109_s2 + $0x30] sm:$0xff] (!%p218_p3) }
   0xa   : > { %v334_v16 = vld [vmem:[%s1109_s2 + $0x48] sm:$0xff] (!%p218_p3)  ;;  %v333_v17 = vld [vmem:[%s1109_s2 + $0x40] sm:$0xff] (!%p218_p3)  ;;  %v336_v18 = vld [vmem:[%s1109_s2 + $0x58] sm:$0xff] (!%p218_p3) }
   0xb   : > { %v916_v19 = vld [vmem:[%s1108_s1 + $0x10] sm:$0xff] (!%p218_p3)   ;;  %v917_v20 = vld [vmem:[%s1108_s1 + $0x28] sm:$0xff] (!%p218_p3)  }
   0xc   : > { %v335_v21 = vld [vmem:[%s1109_s2 + $0x50] sm:$0xff] (!%p218_p3) }
   0xd   : > { %354 = vperm.xlu1 (!%p218_p3), %911, %v328_v6   ;;  %344 = vperm.xlu0 (!%p218_p3), %910, %v326_v9  }
   0xe   : > { %s1118_s18 = smov (!%p272_p4, %s932_s18), 1 }
   0xf   : > { %s867_s22 = sshll.u32 %s1118_s18, 2  ;;  %s1062_s16 = sshll.u32 %s1118_s18, 5 }
  0x10   : > { %s279_s25 = scalar_lea.vmem %s1107_s0, %s867_s22  ;;  %s1068_s23 = scalar_lea.vmem %s1110_s3, %s1062_s16 }
  0x11   : > { %v845_v1 = vld.sshfl [vmem:[%s279_s25] sm:$0x33 pattern:$0x76325410]  ;;  %364 = vperm.xlu1 %911, %v330_v10   ;;  %359 = vperm.xlu0 %910, %v329_v11   ;;  %s1074_s25 = scalar_lea.vmem %s1111_s4, %s1062_s16  ;;  %s1084_s28 = scalar_lea.vmem %s1112_s5, %s1062_s16 }
  0x12   : > { %v435_v3 = vcombine.high %v845_v1, %v845_v1  ;;  %v457_v4 = vsel %vm455_vm0, %v845_v1, 0 }
  0x14   : > { %846 = vmatprep.subr.msk.bf16.mxu0 %vm455_vm0, %v435_v3  ;;  %883 = vmatprep.subr.msk.bf16.mxu1 %vm455_vm0, %v435_v3 }
  0x15   : > { %463 = vmatpush1.bf16.msra.mxu0 %v457_v4  ;;  %884 = vmatpush1.bf16.msra.mxu1 %v457_v4 }
  0x16   : > { %374 = vperm.xlu1 %911, %v332_v12   ;;  %369 = vperm.xlu0 %910, %v331_v15  }
  0x18   : > { %847 = vmatmul.mubr.msk.bf16.vlgmr.msra.gmra.mrb[0].mxu0 %vm436_vm1, %v912_v7  ;;  %850 = vmatmul.mubr.msk.bf16.vlgmr.msra.gmra.mrb[0].mxu1 %vm436_vm1, %v913_v8 }
  0x19   : > { %504 = vmatprep.mubr.bf16.mxu0 %v942_v0  ;;  %534 = vmatprep.mubr.bf16.mxu1 %v942_v0 }
  0x1a   : > { %384 = vperm.xlu1 %911, %v334_v16   ;;  %379 = vperm.xlu0 %910, %v333_v17  }
  0x1e   : > { %394 = vperm.xlu1 %911, %v336_v18   ;;  %389 = vperm.xlu0 %910, %v335_v21  }
  0x20   : > { %848 = vmatmul.mubr.msk.bf16.gmra.mrb[4].mxu0 %vm436_vm1, %v914_v13  ;;  %851 = vmatmul.mubr.msk.bf16.gmra.mrb[4].mxu1 %vm436_vm1, %v915_v14 }
  0x21   : > { %514 = vmatprep.mubr.bf16.mxu0 %v942_v0  ;;  %544 = vmatprep.mubr.bf16.mxu1 %v942_v0 }
  0x28   : > { %849 = vmatmul.mubr.msk.bf16.gmra.mrb[8].mxu0 %vm436_vm1, %v916_v19  ;;  %852 = vmatmul.mubr.msk.bf16.gmra.mrb[8].mxu1 %vm436_vm1, %v917_v20 }
  0x88   : > { %v350_v22 = vpop.permute.xlu1 %349  ;;  %v340_v23 = vpop.permute.xlu0 %339 }
  0x8c   : > { %v355_v24 = vpop.permute.xlu1 %354  ;;  %v345_v25 = vpop.permute.xlu0 %344 }
  0x90   : > { %v1057_v26 = vpop.permute.xlu1 %364  ;;  %v1059_v27 = vpop.permute.xlu0 %359 }
  0x95   : > { %v375_v28 = vpop.permute.xlu1 %374  ;;  %v370_v29 = vpop.permute.xlu0 %369 }
  0x99   : > { %v385_v50 = vpop.permute.xlu1 %384  ;;  %v380_v51 = vpop.permute.xlu0 %379 }
  0x9d   : > { %v395_v8 = vpop.permute.xlu1 %394  ;;  %v390_v9 = vpop.permute.xlu0 %389 }
  0xeb   : > { %v496_v30 = vpop.f32.mrb[0].mxu0  ;;  %v526_v31 = vpop.f32.mrb[0].mxu1 }
  0xec   : > { %v497_v32 = vadd.f32 %v496_v30, %v340_v23  ;;  %v527_v33 = vadd.f32 %v526_v31, %v370_v29  ;;  %v498_v34 = vpop.f32.mrb[1].mxu0  ;;  %v528_v35 = vpop.f32.mrb[1].mxu1 }
  0xed   : > { %v499_v36 = vadd.f32 %v498_v34, %v340_v23  ;;  %v529_v37 = vadd.f32 %v528_v35, %v370_v29  ;;  %v500_v38 = vpop.f32.mrb[2].mxu0  ;;  %v530_v39 = vpop.f32.mrb[2].mxu1 }
  0xee   : > { %v501_v40 = vadd.f32 %v500_v38, %v345_v25  ;;  %v531_v41 = vadd.f32 %v530_v39, %v375_v28  ;;  %v502_v42 = vpop.f32.mrb[3].mxu0  ;;  %v532_v43 = vpop.f32.mrb[3].mxu1 }
  0xef   : > { %v871_v44 = vpack.c.bf16 %v499_v36, %v497_v32  ;;  %v877_v45 = vpack.c.bf16 %v529_v37, %v527_v33  ;;  %v503_v46 = vadd.f32 %v502_v42, %v345_v25  ;;  %v533_v47 = vadd.f32 %v532_v43, %v375_v28 }
  0xf1   : > { %579 = vst [vmem:[%s1068_s23] sm:$0xff] %v871_v44  ;;  %609 = vst [vmem:[%s1074_s25 + $0x10] sm:$0xff] %v877_v45  ;;  %v872_v48 = vpack.c.bf16 %v503_v46, %v501_v40  ;;  %v878_v49 = vpack.c.bf16 %v533_v47, %v531_v41 }
  0xf3   : > { %580 = vst [vmem:[%s1068_s23 + $0x8] sm:$0xff] %v872_v48  ;;  %610 = vst [vmem:[%s1074_s25 + $0x18] sm:$0xff] %v878_v49  ;;  %v506_v52 = vpop.f32.mrb[4].mxu0  ;;  %v536_v53 = vpop.f32.mrb[4].mxu1 }
  0xf4   : > { %v507_v54 = vadd.f32 %v506_v52, %v350_v22  ;;  %v537_v55 = vadd.f32 %v536_v53, %v380_v51  ;;  %v508_v56 = vpop.f32.mrb[5].mxu0  ;;  %v538_v57 = vpop.f32.mrb[5].mxu1 }
  0xf5   : > { %v509_v58 = vadd.f32 %v508_v56, %v350_v22  ;;  %v539_v59 = vadd.f32 %v538_v57, %v380_v51  ;;  %v510_v60 = vpop.f32.mrb[6].mxu0  ;;  %v540_v61 = vpop.f32.mrb[6].mxu1 }
  0xf6   : > { %v511_v62 = vadd.f32 %v510_v60, %v355_v24  ;;  %v541_v63 = vadd.f32 %v540_v61, %v385_v50  ;;  %v512_v0 = vpop.f32.mrb[7].mxu0  ;;  %v542_v1 = vpop.f32.mrb[7].mxu1 }
  0xf7   : > { %v873_v2 = vpack.c.bf16 %v509_v58, %v507_v54  ;;  %v879_v3 = vpack.c.bf16 %v539_v59, %v537_v55  ;;  %v513_v4 = vadd.f32 %v512_v0, %v355_v24  ;;  %v543_v5 = vadd.f32 %v542_v1, %v385_v50 }
  0xf9   : > { %581 = vst [vmem:[%s1068_s23 + $0x10] sm:$0xff] %v873_v2  ;;  %635 = vst [vmem:[%s1084_s28] sm:$0xff] %v879_v3  ;;  %v874_v6 = vpack.c.bf16 %v513_v4, %v511_v62  ;;  %v880_v7 = vpack.c.bf16 %v543_v5, %v541_v63 }
  0xfb   : > { %582 = vst [vmem:[%s1068_s23 + $0x18] sm:$0xff] %v874_v6  ;;  %636 = vst [vmem:[%s1084_s28 + $0x8] sm:$0xff] %v880_v7  ;;  %v516_v10 = vpop.f32.mrb[8].mxu0  ;;  %v546_v11 = vpop.f32.mrb[8].mxu1 }
  0xfc   : > { %v517_v12 = vadd.f32 %v516_v10, %v1059_v27  ;;  %v547_v13 = vadd.f32 %v546_v11, %v390_v9  ;;  %v518_v14 = vpop.f32.mrb[9].mxu0  ;;  %v548_v15 = vpop.f32.mrb[9].mxu1 }
  0xfd   : > { %v519_v16 = vadd.f32 %v518_v14, %v1059_v27  ;;  %v549_v17 = vadd.f32 %v548_v15, %v390_v9  ;;  %v520_v18 = vpop.f32.mrb[10].mxu0  ;;  %v550_v19 = vpop.f32.mrb[10].mxu1 }
  0xfe   : > { %v521_v20 = vadd.f32 %v520_v18, %v1057_v26  ;;  %v551_v21 = vadd.f32 %v550_v19, %v395_v8  ;;  %v522_v22 = vpop.f32.mrb[11].mxu0  ;;  %v552_v23 = vpop.f32.mrb[11].mxu1 }
  0xff   : > { %v875_v24 = vpack.c.bf16 %v519_v16, %v517_v12  ;;  %v881_v25 = vpack.c.bf16 %v549_v17, %v547_v13  ;;  %v523_v28 = vadd.f32 %v522_v22, %v1057_v26  ;;  %v553_v29 = vadd.f32 %v552_v23, %v395_v8 }
 0x101   : > { %607 = vst [vmem:[%s1074_s25] sm:$0xff] %v875_v24  ;;  %637 = vst [vmem:[%s1084_s28 + $0x10] sm:$0xff] %v881_v25  ;;  %v876_v30 = vpack.c.bf16 %v523_v28, %v521_v20  ;;  %v882_v31 = vpack.c.bf16 %v553_v29, %v551_v21 }
 0x103   : > { %608 = vst [vmem:[%s1074_s25 + $0x8] sm:$0xff] %v876_v30  ;;  %638 = vst [vmem:[%s1084_s28 + $0x18] sm:$0xff] %v882_v31 }
 0x104 PF: > { %s16_s20 = sadd.s32 1, %s940_s20   ;;  %s1113_s18 = smov %s936_s19 }
 0x105   : > { %p13_p5 = scmp.ge.s32.totalorder %s16_s20, 4   ;;  %s1114_s19 = smov %s1116_s21 }
 0x107   :  { %15 = sbr.rel (!%p13_p5) target bundleno = 2 (0x2), region = 86 }

// kernel: self_attention_forward.3
= control target key start
LH: loop header
LB: loop body
LE: loop exit
PB: predicated region body
PF: predicated region fallthrough
CT: control target
= control target key end

     0   :  { %s1995_s18 = smov 0   ;;  %s2913_s0 = inlined_call_operand.vmem [shape: bf16[8,8,288], index: 0, kind: input, shape index: {}]   ;;  %s2914_s1 = inlined_call_operand.vmem [shape: bf16[8,8,326], index: 1, kind: input, shape index: {}]   ;;  %s2915_s2 = inlined_call_operand.vmem [shape: bf16[8,8,326], index: 2, kind: input, shape index: {}]   ;;  %s2916_s3 = inlined_call_operand.vmem [shape: f32[8,288], index: 3, kind: input, shape index: {}]   ;;  %s2917_s4 = inlined_call_operand.vmem [shape: f32[8,326], index: 4, kind: input, shape index: {}]   ;;  %s2918_s5 = inlined_call_operand.vmem [shape: f32[8,8,288], index: 5, kind: output, shape index: {}]  }
   0x1 LB: > { %s1760_s19 = sadd.s32 4294967295, %s1955_s18   ;;  %p1764_p0 = scmp.ge.s32.totalorder %s1955_s18, 1  ;;  %s1955_s18 = sphi %s1995_s18, %s15_s18  }
   0x2   : > { %p213_p1 = scmp.lt.s32.totalorder %s1955_s18, 5 }
   0x4   : > { %p214_p2 = pnand %p1764_p0, %p213_p1 }
   0x5   : > { %s1765_s20 = sshll.u32 (!%p214_p2), %s1760_s19, 1  ;;  %v308_v0 = vld [vmem:[%s2917_s4 + $0x10] sm:$0xff] (!%p214_p2)  ;;  %v306_v1 = vld [vmem:[%s2917_s4] sm:$0xff] (!%p214_p2)  ;;  %v307_v9 = vld [vmem:[%s2917_s4 + $0x8] sm:$0xff] (!%p214_p2)  ;;  %s1957_s6 = smov (!%p214_p2), 127   ;;  %vm327_vm0 = vcmask (!%p214_p2), 261120  }
   0x6   : > { %217 = sbr.rel (%p214_p2) target bundleno = 367 (0x16f), region = 40  ;;  %p256_p3 = scmp.lt.s32.totalorder (!%p214_p2), %s1765_s20, 7  ;;  %v305_v35 = vld [vmem:[%s2916_s3 + $0x10] sm:$0xff] (!%p214_p2)  ;;  %v303_v47 = vld [vmem:[%s2916_s3] sm:$0xff] (!%p214_p2)  ;;  %v304_v51 = vld [vmem:[%s2916_s3 + $0x8] sm:$0xff] (!%p214_p2)  ;;  %vm422_vm1 = vcmask (!%p214_p2), 1039360  }
   0x7   : > { %s1958_s7 = smov (!%p214_p2), 126   ;;  %s1959_s8 = smov (!%p214_p2), 110   ;;  %vm946_vm2 = vcmask (!%p214_p2), 1040384   ;;  %vm489_vm3 = vcmask (!%p214_p2), 1031168   ;;  %vm556_vm4 = vcmask (!%p214_p2), 900096   ;;  %vm953_vm5 = vcmask (!%p214_p2), 1041408  }
   0x8   : > { %s1960_s9 = smov (!%p214_p2), 109   ;;  %s1961_s10 = smov (!%p214_p2), 108   ;;  %vm960_vm6 = vcmask (!%p214_p2), 1042432   ;;  %vm623_vm7 = vcmask (!%p214_p2), 891904   ;;  %vm690_vm8 = vcmask (!%p214_p2), 883712   ;;  %vm967_vm9 = vcmask (!%p214_p2), 1043456  }
   0x9   : > { %s1962_s11 = smov (!%p214_p2), 92   ;;  %s1963_s12 = smov (!%p214_p2), 91   ;;  %vm974_vm10 = vcmask (!%p214_p2), 1044480   ;;  %vm757_vm11 = vcmask (!%p214_p2), 752640   ;;  %vm981_vm12 = vcmask (!%p214_p2), 1045504   ;;  %vm824_vm13 = vcmask (!%p214_p2), 744448  }
   0xa   : > { %s1964_s16 = smov (!%p214_p2), 90   ;;  %vm988_vm14 = vcmask (!%p214_p2), 1046528   ;;  %vm891_vm15 = vcmask (!%p214_p2), 736256  }
   0xd   : > { %s2920_s20 = smov (!%p256_p3, %s1765_s20), 7 }
   0xe   : > { %s2006_s21 = smul.u32 12, %s2920_s20 }
   0xf   : > { %s1776_s28 = smul.u32 24, %s2920_s20 }
  0x10   : > { %s267_s24 = scalar_lea.vmem %s2914_s1, %s2006_s21  ;;  %s260_s15 = scalar_lea.vmem %s2913_s0, %s2006_s21 }
  0x11   : > { %v294_v2 = vld [vmem:[%s267_s24 + $0x8] ss:$12 sps:$4 sm:$0xff]   ;;  %v293_v3 = vld [vmem:[%s267_s24] sm:$0xff]  ;;  %v295_v4 = vld [vmem:[%s267_s24 + $0xc] sm:$0xff]  ;;  %s274_s22 = scalar_lea.vmem %s2915_s2, %s2006_s21  ;;  %s281_s30 = scalar_lea.vmem %s2918_s5, %s1776_s28 }
  0x12   : > { %v299_v5 = vunpack.c.l.bf16 %v294_v2  ;;  %v297_v6 = vunpack.c.l.bf16 %v293_v3  ;;  %v300_v7 = vunpack.c.l.bf16 %v295_v4  ;;  %v298_v8 = vunpack.c.h.bf16 %v293_v3  ;;  %v284_v18 = vld [vmem:[%s260_s15 + $0x8] ss:$12 sps:$4 sm:$0xff]   ;;  %v2133_v21 = vld [vmem:[%s274_s22 + $0xc] sm:$0xff]  ;;  %v283_v22 = vld [vmem:[%s260_s15] sm:$0xff] }
  0x13   : > { %v302_v14 = vunpack.c.h.bf16 %v294_v2  ;;  %v301_v15 = vunpack.c.h.bf16 %v295_v4  ;;  %v2125_v19 = vunpack.c.l.bf16 %v284_v18  ;;  %v2127_v20 = vld [vmem:[%s274_s22 + $0x8] ss:$12 sps:$4 sm:$0xff]   ;;  %v2135_v23 = vld [vmem:[%s274_s22] sm:$0xff]  ;;  %v1157_v26 = vunpack.c.l.bf16 %v2133_v21  ;;  %v285_v29 = vld [vmem:[%s260_s15 + $0xc] sm:$0xff] }
  0x14   : > { %v2021_v10 = vsub.f32 %v299_v5, %v308_v0  ;;  %v2023_v11 = vsub.f32 %v297_v6, %v306_v1  ;;  %v2029_v12 = vsub.f32 %v300_v7, %v306_v1  ;;  %v2031_v13 = vsub.f32 %v298_v8, %v307_v9 }
  0x15   : > { %v2037_v16 = vsub.f32 %v302_v14, %v308_v0  ;;  %v2039_v17 = vsub.f32 %v301_v15, %v307_v9  ;;  %v1156_v25 = vunpack.c.l.bf16 %v2127_v20  ;;  %v2141_v27 = vunpack.c.l.bf16 %v283_v22 }
  0x16   : > { %414 = vrot.lane.b32.xlu1 %v2021_v10, %s1957_s6  ;;  %410 = vrot.lane.b32.xlu0 %v2023_v11, %s1957_s6  ;;  %v362_v24 = vmul.f32 %v2021_v10, %v2125_v19  ;;  %v2143_v28 = vunpack.c.h.bf16 %v284_v18  ;;  %v1154_v30 = vunpack.c.l.bf16 %v2135_v23  ;;  %v1155_v31 = vunpack.c.h.bf16 %v2135_v23 }
  0x17   : > { %v2151_v32 = vunpack.c.h.bf16 %v283_v22  ;;  %v2154_v34 = vunpack.c.l.bf16 %v285_v29  ;;  %v2163_v36 = vpack.i.bf16 %v1157_v26, %v1156_v25  ;;  %v360_v37 = vmul.f32 %v2023_v11, %v2141_v27 }
  0x18   : > { %v378_v33 = vsel %vm327_vm0, %v362_v24, 0.0  ;;  %v365_v38 = vmul.f32 %v2037_v16, %v2143_v28  ;;  %v2169_v39 = vunpack.c.h.bf16 %v285_v29  ;;  %v2179_v40 = vpack.i.bf16 %v1155_v31, %v1154_v30 }
  0x19   : > { %v1158_v41 = vunpack.c.h.bf16 %v2133_v21  ;;  %v1159_v42 = vunpack.c.h.bf16 %v2127_v20  ;;  %v361_v43 = vmul.f32 %v2031_v13, %v2151_v32  ;;  %v379_v44 = vrot.slane %v378_v33, 4 }
  0x1a   : > { %416 = vrot.lane.b32.xlu1 %v2029_v12, %s1957_s6  ;;  %412 = vrot.lane.b32.xlu0 %v2031_v13, %s1957_s6  ;;  %v311_v45 = vmul.f32 %v305_v35, %v2125_v19  ;;  %v363_v46 = vmul.f32 %v2029_v12, %v2154_v34  ;;  %v366_v48 = vrot.slane %v360_v37, 4  ;;  %v397_v49 = vsel %vm327_vm0, %v365_v38, 0.0 }
  0x1b   : > { %v364_v50 = vmul.f32 %v2039_v17, %v2169_v39  ;;  %v2205_v52 = vpack.i.bf16 %v1159_v42, %v1158_v41  ;;  %v372_v53 = vrot.slane %v361_v43, 4  ;;  %v380_v54 = vadd.f32 %v379_v44, %v378_v33 }
  0x1c   : > { %v309_v55 = vmul.f32 %v303_v47, %v2141_v27  ;;  %v328_v56 = vsel %vm327_vm0, %v311_v45, 0.0  ;;  %v398_v57 = vrot.slane %v397_v49, 4  ;;  %v385_v58 = vrot.slane %v363_v46, 4 }
  0x1d   : > { %v310_v59 = vmul.f32 %v304_v51, %v2151_v32  ;;  %v314_v60 = vmul.f32 %v305_v35, %v2143_v28  ;;  %v367_v61 = vadd.f32 %v366_v48, %v360_v37  ;;  %v391_v62 = vrot.slane %v364_v50, 4 }
  0x1e   : > { %420 = vrot.lane.b32.xlu1 %v2037_v16, %s1957_s6  ;;  %418 = vrot.lane.b32.xlu0 %v2039_v17, %s1957_s6  ;;  %v373_v63 = vadd.f32 %v372_v53, %v361_v43  ;;  %v329_v0 = vrot.slane %v328_v56, 4  ;;  %v381_v1 = vrot.slane %v380_v54, 2  ;;  %v315_v2 = vrot.slane %v309_v55, 4 }
  0x1f   : > { %v399_v3 = vadd.f32 %v398_v57, %v397_v49  ;;  %v386_v4 = vadd.f32 %v385_v58, %v363_v46  ;;  %v321_v5 = vrot.slane %v310_v59, 4  ;;  %v347_v6 = vsel %vm327_vm0, %v314_v60, 0.0 }
  0x20   : > { %v368_v7 = vrot.slane %v367_v61, 2  ;;  %v392_v8 = vadd.f32 %v391_v62, %v364_v50  ;;  %v312_v9 = vmul.f32 %v303_v47, %v2154_v34  ;;  %v313_v14 = vmul.f32 %v304_v51, %v2169_v39 }
  0x21   : > { %v382_v15 = vadd.f32 %v381_v1, %v380_v54  ;;  %v322_v18 = vadd.f32 %v321_v5, %v310_v59 }
  0x22   : > { %479 = vrot.lane.b32.xlu1 %v2031_v13, %s1958_s7  ;;  %477 = vrot.lane.b32.xlu0 %v2023_v11, %s1958_s7  ;;  %v369_v22 = vadd.f32 %v368_v7, %v367_v61  ;;  %v393_v24 = vrot.slane %v392_v8, 2  ;;  %v335_v29 = vrot.slane %v312_v9, 4  ;;  %v341_v43 = vrot.slane %v313_v14, 4 }
  0x23   : > { %v383_v44 = vrot.slane %v382_v15, 1  ;;  %v323_v47 = vrot.slane %v322_v18, 2 }
  0x24   : > { %v370_v48 = vrot.slane %v369_v22, 1  ;;  %v394_v49 = vadd.f32 %v393_v24, %v392_v8  ;;  %v336_v50 = vadd.f32 %v335_v29, %v312_v9 }
  0x25   : > { %v2230_v58 = vadd.f32 %v383_v44, %v382_v15  ;;  %v324_v62 = vadd.f32 %v323_v47, %v322_v18 }
  0x26   : > { %483 = vrot.lane.b32.xlu1 %v2029_v12, %s1958_s7  ;;  %481 = vrot.lane.b32.xlu0 %v2021_v10, %s1958_s7  ;;  %v395_v1 = vrot.slane %v394_v49, 1 }
  0x2a   : > { %487 = vrot.lane.b32.xlu1 %v2037_v16, %s1958_s7  ;;  %485 = vrot.lane.b32.xlu0 %v2039_v17, %s1958_s7 }
  0x2e   : > { %546 = vrot.lane.b32.xlu1 %v2031_v13, %s1959_s8  ;;  %544 = vrot.lane.b32.xlu0 %v2023_v11, %s1959_s8 }
  0x32   : > { %550 = vrot.lane.b32.xlu1 %v2029_v12, %s1959_s8  ;;  %548 = vrot.lane.b32.xlu0 %v2021_v10, %s1959_s8 }
  0x36   : > { %554 = vrot.lane.b32.xlu1 %v2037_v16, %s1959_s8  ;;  %552 = vrot.lane.b32.xlu0 %v2039_v17, %s1959_s8 }
  0x3a   : > { %613 = vrot.lane.b32.xlu1 %v2031_v13, %s1960_s9  ;;  %611 = vrot.lane.b32.xlu0 %v2023_v11, %s1960_s9 }
  0x3e   : > { %617 = vrot.lane.b32.xlu1 %v2029_v12, %s1960_s9  ;;  %615 = vrot.lane.b32.xlu0 %v2021_v10, %s1960_s9 }
  0x42   : > { %621 = vrot.lane.b32.xlu1 %v2037_v16, %s1960_s9  ;;  %619 = vrot.lane.b32.xlu0 %v2039_v17, %s1960_s9 }
  0x46   : > { %680 = vrot.lane.b32.xlu1 %v2031_v13, %s1961_s10  ;;  %678 = vrot.lane.b32.xlu0 %v2023_v11, %s1961_s10 }
  0x4a   : > { %684 = vrot.lane.b32.xlu1 %v2029_v12, %s1961_s10  ;;  %682 = vrot.lane.b32.xlu0 %v2021_v10, %s1961_s10 }
  0x4e   : > { %749 = vrot.lane.b32.xlu1 %v2021_v10, %s1962_s11  ;;  %688 = vrot.lane.b32.xlu0 %v2037_v16, %s1961_s10 }
  0x52   : > { %745 = vrot.lane.b32.xlu1 %v2023_v11, %s1962_s11  ;;  %686 = vrot.lane.b32.xlu0 %v2039_v17, %s1961_s10 }
  0x56   : > { %755 = vrot.lane.b32.xlu1 %v2037_v16, %s1962_s11  ;;  %747 = vrot.lane.b32.xlu0 %v2031_v13, %s1962_s11 }
  0x5a   : > { %751 = vrot.lane.b32.xlu1 %v2029_v12, %s1962_s11  ;;  %816 = vrot.lane.b32.xlu0 %v2021_v10, %s1963_s12 }
  0x5e   : > { %812 = vrot.lane.b32.xlu1 %v2023_v11, %s1963_s12  ;;  %753 = vrot.lane.b32.xlu0 %v2039_v17, %s1962_s11 }
  0x62   : > { %822 = vrot.lane.b32.xlu1 %v2037_v16, %s1963_s12  ;;  %814 = vrot.lane.b32.xlu0 %v2031_v13, %s1963_s12 }
  0x66   : > { %881 = vrot.lane.b32.xlu1 %v2031_v13, %s1964_s16  ;;  %879 = vrot.lane.b32.xlu0 %v2023_v11, %s1964_s16  ;;  %v330_v11 = vadd.f32 %v329_v0, %v328_v56  ;;  %v348_v13 = vrot.slane %v347_v6, 4  ;;  %v342_v56 = vadd.f32 %v341_v43, %v313_v14  ;;  %v2233_v0 = vadd.f32 %v370_v48, %v369_v22 }
  0x67   : > { %v325_v14 = vrot.slane %v324_v62, 1 }
  0x68   : > { %v331_v35 = vrot.slane %v330_v11, 2  ;;  %v349_v38 = vadd.f32 %v348_v13, %v347_v6  ;;  %v343_v8 = vrot.slane %v342_v56, 2 }
  0x69   : > { %v2260_v48 = vadd.f32 %v325_v14, %v324_v62 }
  0x6a   : > { %818 = vrot.lane.b32.xlu1 %v2029_v12, %s1963_s12  ;;  %883 = vrot.lane.b32.xlu0 %v2021_v10, %s1964_s16  ;;  %v374_v10 = vrot.slane %v373_v63, 2  ;;  %v332_v53 = vadd.f32 %v331_v35, %v330_v11 }
  0x6c   : > { %v375_v33 = vadd.f32 %v374_v10, %v373_v63 }
  0x6e   : > { %885 = vrot.lane.b32.xlu1 %v2029_v12, %s1964_s16  ;;  %820 = vrot.lane.b32.xlu0 %v2039_v17, %s1963_s12  ;;  %v316_v12 = vadd.f32 %v315_v2, %v309_v55  ;;  %v376_v51 = vrot.slane %v375_v33, 1  ;;  %v350_v55 = vrot.slane %v349_v38, 2  ;;  %v337_v2 = vrot.slane %v336_v50, 2 }
  0x70   : > { %v317_v37 = vrot.slane %v316_v12, 2  ;;  %v351_v7 = vadd.f32 %v350_v55, %v349_v38  ;;  %v338_v18 = vadd.f32 %v337_v2, %v336_v50  ;;  %v344_v38 = vadd.f32 %v343_v8, %v342_v56 }
  0x72   : > { %889 = vrot.lane.b32.xlu1 %v2037_v16, %s1964_s16  ;;  %887 = vrot.lane.b32.xlu0 %v2039_v17, %s1964_s16  ;;  %v400_v16 = vrot.slane %v399_v3, 2  ;;  %v387_v17 = vrot.slane %v386_v4, 2  ;;  %v318_v54 = vadd.f32 %v317_v37, %v316_v12  ;;  %v352_v37 = vrot.slane %v351_v7, 1 }
  0x73   : > { %v339_v55 = vrot.slane %v338_v18, 1  ;;  %v345_v62 = vrot.slane %v344_v38, 1 }
  0x74   : > { %v401_v45 = vadd.f32 %v400_v16, %v399_v3  ;;  %v388_v46 = vadd.f32 %v387_v17, %v386_v4  ;;  %v2239_v3 = vadd.f32 %v376_v51, %v375_v33  ;;  %v333_v4 = vrot.slane %v332_v53, 1 }
  0x75   : > { %v319_v6 = vrot.slane %v318_v54, 1  ;;  %v2248_v17 = vadd.f32 %v395_v1, %v394_v49 }
  0x76   : > { %1799 = vrot.lane.b32.xlu1 %v2163_v36, %s1957_s6  ;;  %1794 = vrot.lane.b32.xlu0 %v2179_v40, %s1957_s6  ;;  %v402_v60 = vrot.slane %v401_v45, 1  ;;  %v389_v61 = vrot.slane %v388_v46, 1  ;;  %v2258_v35 = vadd.f32 %v333_v4, %v332_v53 }
  0x77   : > { %v2256_v33 = vadd.f32 %v319_v6, %v318_v54 }
  0x78   : > { %v2242_v12 = vadd.f32 %v402_v60, %v401_v45  ;;  %v2244_v13 = vadd.f32 %v389_v61, %v388_v46  ;;  %v2272_v61 = vadd.f32 %v352_v37, %v351_v7  ;;  %v2282_v37 = vadd.f32 %v345_v62, %v344_v38 }
  0x7a   : > { %1809 = vrot.lane.b32.xlu1 %v2179_v40, %s1958_s7  ;;  %1804 = vrot.lane.b32.xlu0 %v2205_v52, %s1957_s6 }
  0x7e   : > { %1819 = vrot.lane.b32.xlu1 %v2205_v52, %s1958_s7  ;;  %1814 = vrot.lane.b32.xlu0 %v2163_v36, %s1958_s7 }
  0x82   : > { %1829 = vrot.lane.b32.xlu1 %v2163_v36, %s1959_s8  ;;  %1824 = vrot.lane.b32.xlu0 %v2179_v40, %s1959_s8 }
  0x86   : > { %1839 = vrot.lane.b32.xlu1 %v2179_v40, %s1960_s9  ;;  %1834 = vrot.lane.b32.xlu0 %v2205_v52, %s1959_s8 }
  0x88   : > { %v415_v57 = vpop.permute.xlu1 %414  ;;  %v411_v59 = vpop.permute.xlu0 %410 }
  0x89   : > { %v435_v63 = vmul.f32 %v415_v57, %v2125_v19 }
  0x8a   : > { %1849 = vrot.lane.b32.xlu1 %v2205_v52, %s1960_s9  ;;  %1844 = vrot.lane.b32.xlu0 %v2163_v36, %s1960_s9 }
  0x8b   : > { %v451_v5 = vsel %vm327_vm0, %v435_v63, 0.0 }
  0x8c   : > { %v452_v9 = vrot.slane %v451_v5, 4  ;;  %v417_v10 = vpop.permute.xlu1 %416  ;;  %v413_v11 = vpop.permute.xlu0 %412 }
  0x8d   : > { %v423_v15 = vsel %vm422_vm1, %v411_v59, %v413_v11  ;;  %v424_v16 = vsel %vm422_vm1, %v413_v11, %v415_v57  ;;  %v2275_v11 = vadd.f32 %v339_v55, %v338_v18 }
  0x8e   : > { %v453_v22 = vadd.f32 %v452_v9, %v451_v5  ;;  %v433_v24 = vmul.f32 %v423_v15, %v2141_v27  ;;  %v434_v29 = vmul.f32 %v424_v16, %v2151_v32  ;;  %1859 = vrot.lane.b32.xlu1 %v2163_v36, %s1961_s10  ;;  %1854 = vrot.lane.b32.xlu0 %v2179_v40, %s1961_s10 }
  0x90   : > { %v454_v43 = vrot.slane %v453_v22, 2  ;;  %v439_v44 = vrot.slane %v433_v24, 4  ;;  %v445_v45 = vrot.slane %v434_v29, 4  ;;  %v421_v46 = vpop.permute.xlu1 %420  ;;  %v419_v47 = vpop.permute.xlu0 %418 }
  0x91   : > { %v438_v49 = vmul.f32 %v421_v46, %v2143_v28  ;;  %v425_v50 = vsel %vm422_vm1, %v417_v10, %v419_v47  ;;  %v426_v51 = vsel %vm422_vm1, %v419_v47, %v421_v46 }
  0x92   : > { %v455_v54 = vadd.f32 %v454_v43, %v453_v22  ;;  %v440_v57 = vadd.f32 %v439_v44, %v433_v24  ;;  %v446_v53 = vadd.f32 %v445_v45, %v434_v29  ;;  %v436_v59 = vmul.f32 %v425_v50, %v2154_v34  ;;  %1869 = vrot.lane.b32.xlu1 %v2179_v40, %s1962_s11 }
  0x93   : > { %v470_v56 = vsel %vm327_vm0, %v438_v49, 0.0  ;;  %v437_v60 = vmul.f32 %v426_v51, %v2169_v39  ;;  %1864 = vrot.lane.b32.xlu0 %v2205_v52, %s1961_s10 }
  0x94   : > { %v456_v63 = vrot.slane %v455_v54, 1  ;;  %v441_v1 = vrot.slane %v440_v57, 2  ;;  %v447_v2 = vrot.slane %v446_v53, 2  ;;  %v471_v4 = vrot.slane %v470_v56, 4  ;;  %v480_v5 = vpop.permute.xlu1 %479  ;;  %v478_v6 = vpop.permute.xlu0 %477 }
  0x95   : > { %v458_v8 = vrot.slane %v436_v59, 4  ;;  %v464_v9 = vrot.slane %v437_v60, 4  ;;  %v490_v10 = vsel %vm489_vm3, %v478_v6, %v480_v5 }
  0x96   : > { %v457_v14 = vadd.f32 %v456_v63, %v455_v54  ;;  %v442_v15 = vadd.f32 %v441_v1, %v440_v57  ;;  %v448_v16 = vadd.f32 %v447_v2, %v446_v53  ;;  %v472_v22 = vadd.f32 %v471_v4, %v470_v56  ;;  %1879 = vrot.lane.b32.xlu1 %v2205_v52, %s1962_s11 }
  0x97   : > { %v459_v7 = vadd.f32 %v458_v8, %v436_v59  ;;  %v465_v24 = vadd.f32 %v464_v9, %v437_v60  ;;  %v500_v29 = vmul.f32 %v490_v10, %v2141_v27  ;;  %1874 = vrot.lane.b32.xlu0 %v2163_v36, %s1962_s11 }
  0x98   : > { %v2286_v18 = vsel %vm946_vm2, %v2230_v58, %v457_v14  ;;  %v443_v43 = vrot.slane %v442_v15, 1  ;;  %v449_v44 = vrot.slane %v448_v16, 1  ;;  %v473_v45 = vrot.slane %v472_v22, 2  ;;  %v484_v46 = vpop.permute.xlu1 %483  ;;  %v482_v47 = vpop.permute.xlu0 %481 }
  0x99   : > { %v460_v49 = vrot.slane %v459_v7, 2  ;;  %v466_v50 = vrot.slane %v465_v24, 2  ;;  %v506_v51 = vrot.slane %v500_v29, 4  ;;  %v491_v55 = vsel %vm489_vm3, %v480_v5, %v482_v47 }
  0x9a   : > { %v444_v54 = vadd.f32 %v443_v43, %v442_v15  ;;  %v450_v57 = vadd.f32 %v449_v44, %v448_v16  ;;  %v474_v53 = vadd.f32 %v473_v45, %v472_v22  ;;  %v501_v38 = vmul.f32 %v491_v55, %v2151_v32  ;;  %1889 = vrot.lane.b32.xlu1 %v2163_v36, %s1963_s12 }
  0x9b   : > { %v461_v58 = vadd.f32 %v460_v49, %v459_v7  ;;  %v467_v59 = vadd.f32 %v466_v50, %v465_v24  ;;  %v507_v56 = vadd.f32 %v506_v51, %v500_v29  ;;  %v502_v60 = vmul.f32 %v482_v47, %v2125_v19  ;;  %1884 = vrot.lane.b32.xlu0 %v2179_v40, %s1963_s12 }
  0x9c   : > { %v947_v62 = vsel %vm946_vm2, %v2233_v0, %v444_v54  ;;  %v948_v63 = vsel %vm946_vm2, %v2239_v3, %v450_v57  ;;  %v475_v1 = vrot.slane %v474_v53, 1  ;;  %v512_v2 = vrot.slane %v501_v38, 4  ;;  %v488_v4 = vpop.permute.xlu1 %487  ;;  %v486_v5 = vpop.permute.xlu0 %485 }
  0x9d   : > { %v462_v6 = vrot.slane %v461_v58, 1  ;;  %v468_v8 = vrot.slane %v467_v59, 1  ;;  %v508_v9 = vrot.slane %v507_v56, 2  ;;  %v518_v10 = vsel %vm327_vm0, %v502_v60, 0.0 }
  0x9e   : > { %v476_v14 = vadd.f32 %v475_v1, %v474_v53  ;;  %v513_v15 = vadd.f32 %v512_v2, %v501_v38  ;;  %v519_v16 = vrot.slane %v518_v10, 4  ;;  %v505_v22 = vmul.f32 %v488_v4, %v2143_v28  ;;  %1899 = vrot.lane.b32.xlu1 %v2179_v40, %s1964_s16 }
  0x9f   : > { %v463_v0 = vadd.f32 %v462_v6, %v461_v58  ;;  %v469_v7 = vadd.f32 %v468_v8, %v467_v59  ;;  %v509_v3 = vadd.f32 %v508_v9, %v507_v56  ;;  %v492_v24 = vsel %vm489_vm3, %v484_v46, %v486_v5  ;;  %1894 = vrot.lane.b32.xlu0 %v2205_v52, %s1963_s12 }
  0xa0   : > { %v2308_v29 = vsel %vm946_vm2, %v2242_v12, %v476_v14  ;;  %v514_v43 = vrot.slane %v513_v15, 2  ;;  %v520_v44 = vadd.f32 %v519_v16, %v518_v10  ;;  %v537_v45 = vsel %vm327_vm0, %v505_v22, 0.0  ;;  %v547_v47 = vpop.permute.xlu1 %546  ;;  %v545_v49 = vpop.permute.xlu0 %544 }
  0xa1   : > { %v2313_v40 = vsel %vm946_vm2, %v2244_v13, %v463_v0  ;;  %v2317_v46 = vsel %vm946_vm2, %v2248_v17, %v469_v7  ;;  %v510_v50 = vrot.slane %v509_v3, 1  ;;  %v538_v51 = vrot.slane %v537_v45, 4 }
  0xa2   : > { %v515_v55 = vadd.f32 %v514_v43, %v513_v15  ;;  %v521_v54 = vrot.slane %v520_v44, 2  ;;  %v493_v12 = vsel %vm489_vm3, %v486_v5, %v488_v4  ;;  %v503_v57 = vmul.f32 %v492_v24, %v2154_v34  ;;  %1909 = vrot.lane.b32.xlu1 %v2205_v52, %s1964_s16 }
  0xa3   : > { %v511_v53 = vadd.f32 %v510_v50, %v509_v3  ;;  %v539_v38 = vadd.f32 %v538_v51, %v537_v45  ;;  %v504_v13 = vmul.f32 %v493_v12, %v2169_v39  ;;  %v557_v58 = vsel %vm556_vm4, %v545_v49, %v547_v47  ;;  %1904 = vrot.lane.b32.xlu0 %v2163_v36, %s1964_s16 }
  0xa4   : > { %v516_v17 = vrot.slane %v515_v55, 1  ;;  %v522_v59 = vadd.f32 %v521_v54, %v520_v44  ;;  %v525_v56 = vrot.slane %v503_v57, 4  ;;  %v567_v60 = vmul.f32 %v557_v58, %v2141_v27  ;;  %v551_v1 = vpop.permute.xlu1 %550  ;;  %v549_v2 = vpop.permute.xlu0 %548 }
  0xa5   : > { %v954_v4 = vsel %vm953_vm5, %v947_v62, %v511_v53  ;;  %v540_v5 = vrot.slane %v539_v38, 2  ;;  %v531_v52 = vrot.slane %v504_v13, 4  ;;  %v558_v6 = vsel %vm556_vm4, %v547_v47, %v549_v2 }
  0xa6   : > { %v517_v8 = vadd.f32 %v516_v17, %v515_v55  ;;  %v523_v9 = vrot.slane %v522_v59, 1  ;;  %v526_v10 = vadd.f32 %v525_v56, %v503_v57  ;;  %v573_v14 = vrot.slane %v567_v60, 4 }
  0xa7   : > { %v541_v15 = vadd.f32 %v540_v5, %v539_v38  ;;  %v532_v16 = vadd.f32 %v531_v52, %v504_v13  ;;  %v568_v36 = vmul.f32 %v558_v6, %v2151_v32  ;;  %v569_v22 = vmul.f32 %v549_v2, %v2125_v19 }
  0xa8   : > { %v524_v0 = vadd.f32 %v523_v9, %v522_v59  ;;  %v955_v7 = vsel %vm953_vm5, %v948_v63, %v517_v8  ;;  %v527_v62 = vrot.slane %v526_v10, 2  ;;  %v574_v3 = vadd.f32 %v573_v14, %v567_v60  ;;  %v555_v24 = vpop.permute.xlu1 %554  ;;  %v553_v43 = vpop.permute.xlu0 %552 }
  0xa9   : > { %v542_v44 = vrot.slane %v541_v15, 1  ;;  %v533_v45 = vrot.slane %v532_v16, 2  ;;  %v579_v47 = vrot.slane %v568_v36, 4  ;;  %v585_v49 = vsel %vm327_vm0, %v569_v22, 0.0 }
  0xaa   : > { %v956_v50 = vsel %vm953_vm5, %v2286_v18, %v524_v0  ;;  %v528_v51 = vadd.f32 %v527_v62, %v526_v10  ;;  %v575_v55 = vrot.slane %v574_v3, 2  ;;  %v586_v54 = vrot.slane %v585_v49, 4 }
  0xab   : > { %v543_v12 = vadd.f32 %v542_v44, %v541_v15  ;;  %v534_v57 = vadd.f32 %v533_v45, %v532_v16  ;;  %v580_v53 = vadd.f32 %v579_v47, %v568_v36  ;;  %v572_v63 = vmul.f32 %v555_v24, %v2143_v28 }
  0xac   : > { %v529_v38 = vrot.slane %v528_v51, 1  ;;  %v576_v13 = vadd.f32 %v575_v55, %v574_v3  ;;  %v587_v58 = vadd.f32 %v586_v54, %v585_v49  ;;  %v559_v17 = vsel %vm556_vm4, %v551_v1, %v553_v43  ;;  %v614_v59 = vpop.permute.xlu1 %613  ;;  %v612_v56 = vpop.permute.xlu0 %611 }
  0xad   : > { %v959_v60 = vsel %vm953_vm5, %v2308_v29, %v543_v12  ;;  %v535_v2 = vrot.slane %v534_v57, 1  ;;  %v581_v18 = vrot.slane %v580_v53, 2  ;;  %v604_v5 = vsel %vm327_vm0, %v572_v63, 0.0 }
  0xae   : > { %v530_v52 = vadd.f32 %v529_v38, %v528_v51  ;;  %v577_v6 = vrot.slane %v576_v13, 1  ;;  %v588_v8 = vrot.slane %v587_v58, 2  ;;  %v605_v9 = vrot.slane %v604_v5, 4 }
  0xaf   : > { %v536_v10 = vadd.f32 %v535_v2, %v534_v57  ;;  %v582_v14 = vadd.f32 %v581_v18, %v580_v53  ;;  %v560_v15 = vsel %vm556_vm4, %v553_v43, %v555_v24  ;;  %v570_v16 = vmul.f32 %v559_v17, %v2154_v34 }
  0xb0   : > { %v2345_v1 = vsel %vm953_vm5, %v2313_v40, %v530_v52  ;;  %v578_v36 = vadd.f32 %v577_v6, %v576_v13  ;;  %v589_v29 = vadd.f32 %v588_v8, %v587_v58  ;;  %v606_v22 = vadd.f32 %v605_v9, %v604_v5  ;;  %v618_v0 = vpop.permute.xlu1 %617  ;;  %v616_v62 = vpop.permute.xlu0 %615 }
  0xb1   : > { %v2349_v3 = vsel %vm953_vm5, %v2317_v46, %v536_v10  ;;  %v583_v44 = vrot.slane %v582_v14, 1  ;;  %v571_v45 = vmul.f32 %v560_v15, %v2169_v39  ;;  %v592_v47 = vrot.slane %v570_v16, 4 }
  0xb2   : > { %v2353_v24 = vsel %vm960_vm6, %v954_v4, %v578_v36  ;;  %v590_v43 = vrot.slane %v589_v29, 1  ;;  %v607_v49 = vrot.slane %v606_v22, 2  ;;  %v624_v40 = vsel %vm623_vm7, %v612_v56, %v614_v59 }
  0xb3   : > { %v584_v51 = vadd.f32 %v583_v44, %v582_v14  ;;  %v593_v55 = vadd.f32 %v592_v47, %v570_v16  ;;  %v598_v54 = vrot.slane %v571_v45, 4  ;;  %v634_v12 = vmul.f32 %v624_v40, %v2141_v27 }
  0xb4   : > { %v591_v57 = vadd.f32 %v590_v43, %v589_v29  ;;  %v608_v53 = vadd.f32 %v607_v49, %v606_v22  ;;  %v625_v46 = vsel %vm623_vm7, %v614_v59, %v616_v62  ;;  %v636_v63 = vmul.f32 %v616_v62, %v2125_v19  ;;  %v622_v38 = vpop.permute.xlu1 %621  ;;  %v620_v13 = vpop.permute.xlu0 %619 }
  0xb5   : > { %v2360_v4 = vsel %vm960_vm6, %v955_v7, %v584_v51  ;;  %v594_v58 = vrot.slane %v593_v55, 2  ;;  %v599_v17 = vadd.f32 %v598_v54, %v571_v45  ;;  %v640_v56 = vrot.slane %v634_v12, 4 }
  0xb6   : > { %v963_v2 = vsel %vm960_vm6, %v956_v50, %v591_v57  ;;  %v609_v18 = vrot.slane %v608_v53, 1  ;;  %v635_v5 = vmul.f32 %v625_v46, %v2151_v32  ;;  %v652_v52 = vsel %vm327_vm0, %v636_v63, 0.0 }
  0xb7   : > { %v595_v59 = vadd.f32 %v594_v58, %v593_v55  ;;  %v600_v6 = vrot.slane %v599_v17, 2  ;;  %v641_v8 = vadd.f32 %v640_v56, %v634_v12  ;;  %v653_v9 = vrot.slane %v652_v52, 4 }
  0xb8   : > { %v610_v10 = vadd.f32 %v609_v18, %v608_v53  ;;  %v646_v14 = vrot.slane %v635_v5, 4  ;;  %v639_v7 = vmul.f32 %v622_v38, %v2143_v28  ;;  %v626_v15 = vsel %vm623_vm7, %v618_v0, %v620_v13  ;;  %v681_v16 = vpop.permute.xlu1 %680  ;;  %v679_v36 = vpop.permute.xlu0 %678 }
  0xb9   : > { %v596_v29 = vrot.slane %v595_v59, 1  ;;  %v601_v50 = vadd.f32 %v600_v6, %v599_v17  ;;  %v642_v22 = vrot.slane %v641_v8, 2  ;;  %v654_v62 = vadd.f32 %v653_v9, %v652_v52 }
  0xba   : > { %v2368_v44 = vsel %vm960_vm6, %v959_v60, %v610_v10  ;;  %v647_v45 = vadd.f32 %v646_v14, %v635_v5  ;;  %v671_v47 = vsel %vm327_vm0, %v639_v7, 0.0  ;;  %v627_v43 = vsel %vm623_vm7, %v620_v13, %v622_v38 }
  0xbb   : > { %v597_v49 = vadd.f32 %v596_v29, %v595_v59  ;;  %v602_v40 = vrot.slane %v601_v50, 1  ;;  %v643_v51 = vadd.f32 %v642_v22, %v641_v8  ;;  %v655_v55 = vrot.slane %v654_v62, 2 }
  0xbc   : > { %v648_v54 = vrot.slane %v647_v45, 2  ;;  %v672_v0 = vrot.slane %v671_v47, 4  ;;  %v637_v12 = vmul.f32 %v626_v15, %v2154_v34  ;;  %v638_v57 = vmul.f32 %v627_v43, %v2169_v39  ;;  %v2374_v53 = vpop.permute.xlu1 %684  ;;  %v683_v46 = vpop.permute.xlu0 %682 }
  0xbd   : > { %v603_v60 = vadd.f32 %v602_v40, %v601_v50  ;;  %v964_v63 = vsel %vm960_vm6, %v2345_v1, %v597_v49  ;;  %v644_v58 = vrot.slane %v643_v51, 1  ;;  %v656_v17 = vadd.f32 %v655_v55, %v654_v62 }
  0xbe   : > { %v649_v38 = vadd.f32 %v648_v54, %v647_v45  ;;  %v673_v13 = vadd.f32 %v672_v0, %v671_v47  ;;  %v659_v56 = vrot.slane %v637_v12, 4  ;;  %v665_v18 = vrot.slane %v638_v57, 4 }
  0xbf   : > { %v965_v5 = vsel %vm960_vm6, %v2349_v3, %v603_v60  ;;  %v645_v52 = vadd.f32 %v644_v58, %v643_v51  ;;  %v657_v59 = vrot.slane %v656_v17, 1  ;;  %v691_v6 = vsel %vm690_vm8, %v679_v36, %v681_v16 }
  0xc0   : > { %v650_v8 = vrot.slane %v649_v38, 1  ;;  %v674_v9 = vrot.slane %v673_v13, 2  ;;  %v660_v10 = vadd.f32 %v659_v56, %v637_v12  ;;  %v666_v14 = vadd.f32 %v665_v18, %v638_v57  ;;  %v2381_v7 = vpop.permute.xlu1 %749  ;;  %v689_v1 = vpop.permute.xlu0 %688 }
  0xc1   : > { %v2385_v15 = vsel %vm967_vm9, %v2353_v24, %v645_v52  ;;  %v658_v29 = vadd.f32 %v657_v59, %v656_v17  ;;  %v701_v50 = vmul.f32 %v691_v6, %v2141_v27  ;;  %v692_v3 = vsel %vm690_vm8, %v681_v16, %v683_v46 }
  0xc2   : > { %v651_v22 = vadd.f32 %v650_v8, %v649_v38  ;;  %v675_v62 = vadd.f32 %v674_v9, %v673_v13  ;;  %v661_v45 = vrot.slane %v660_v10, 2  ;;  %v667_v36 = vrot.slane %v666_v14, 2 }
  0xc3   : > { %v2390_v47 = vsel %vm967_vm9, %v963_v2, %v658_v29  ;;  %v707_v43 = vrot.slane %v701_v50, 4  ;;  %v702_v49 = vmul.f32 %v692_v3, %v2151_v32  ;;  %v703_v40 = vmul.f32 %v683_v46, %v2125_v19 }
  0xc4   : > { %v2396_v24 = vsel %vm967_vm9, %v2360_v4, %v651_v22  ;;  %v676_v51 = vrot.slane %v675_v62, 1  ;;  %v662_v55 = vadd.f32 %v661_v45, %v660_v10  ;;  %v668_v54 = vadd.f32 %v667_v36, %v666_v14  ;;  %v2398_v16 = vpop.permute.xlu1 %745  ;;  %v687_v0 = vpop.permute.xlu0 %686 }
  0xc5   : > { %v708_v12 = vadd.f32 %v707_v43, %v701_v50  ;;  %v713_v57 = vrot.slane %v702_v49, 4  ;;  %v719_v2 = vsel %vm327_vm0, %v703_v40, 0.0  ;;  %v770_v60 = vmul.f32 %v2381_v7, %v2125_v19 }
  0xc6   : > { %v677_v58 = vadd.f32 %v676_v51, %v675_v62  ;;  %v663_v46 = vrot.slane %v662_v55, 1  ;;  %v669_v17 = vrot.slane %v668_v54, 1  ;;  %v720_v38 = vrot.slane %v719_v2, 4 }
  0xc7   : > { %v709_v4 = vrot.slane %v708_v12, 2  ;;  %v714_v13 = vadd.f32 %v713_v57, %v702_v49  ;;  %v786_v56 = vsel %vm327_vm0, %v770_v60, 0.0  ;;  %v706_v18 = vmul.f32 %v689_v1, %v2143_v28 }
  0xc8   : > { %v2407_v52 = vsel %vm967_vm9, %v2368_v44, %v677_v58  ;;  %v664_v59 = vadd.f32 %v663_v46, %v662_v55  ;;  %v670_v6 = vadd.f32 %v669_v17, %v668_v54  ;;  %v721_v8 = vadd.f32 %v720_v38, %v719_v2  ;;  %v2409_v9 = vpop.permute.xlu1 %755  ;;  %v748_v10 = vpop.permute.xlu0 %747 }
  0xc9   : > { %v710_v14 = vadd.f32 %v709_v4, %v708_v12  ;;  %v715_v29 = vrot.slane %v714_v13, 2  ;;  %v787_v50 = vrot.slane %v786_v56, 4  ;;  %v738_v3 = vsel %vm327_vm0, %v706_v18, 0.0 }
  0xca   : > { %v2413_v22 = vsel %vm967_vm9, %v964_v63, %v664_v59  ;;  %v2416_v62 = vsel %vm967_vm9, %v965_v5, %v670_v6  ;;  %v722_v45 = vrot.slane %v721_v8, 2  ;;  %v739_v44 = vrot.slane %v738_v3, 4 }
  0xcb   : > { %v711_v36 = vrot.slane %v710_v14, 1  ;;  %v716_v43 = vadd.f32 %v715_v29, %v714_v13  ;;  %v788_v49 = vadd.f32 %v787_v50, %v786_v56  ;;  %v693_v40 = vsel %vm690_vm8, %v2374_v53, %v687_v0 }
  0xcc   : > { %v723_v51 = vadd.f32 %v722_v45, %v721_v8  ;;  %v740_v55 = vadd.f32 %v739_v44, %v738_v3  ;;  %v694_v54 = vsel %vm690_vm8, %v687_v0, %v689_v1  ;;  %v704_v12 = vmul.f32 %v693_v40, %v2154_v34  ;;  %v752_v63 = vpop.permute.xlu1 %751  ;;  %v2422_v57 = vpop.permute.xlu0 %816 }
  0xcd   : > { %v712_v5 = vadd.f32 %v711_v36, %v710_v14  ;;  %v717_v2 = vrot.slane %v716_v43, 1  ;;  %v789_v60 = vrot.slane %v788_v49, 2  ;;  %v705_v58 = vmul.f32 %v694_v54, %v2169_v39 }
  0xce   : > { %v724_v46 = vrot.slane %v723_v51, 1  ;;  %v741_v17 = vrot.slane %v740_v55, 2  ;;  %v726_v38 = vrot.slane %v704_v12, 4  ;;  %v773_v53 = vmul.f32 %v2409_v9, %v2143_v28 }
  0xcf   : > { %v2429_v4 = vsel %vm974_vm10, %v2385_v15, %v712_v5  ;;  %v718_v1 = vadd.f32 %v717_v2, %v716_v43  ;;  %v790_v0 = vadd.f32 %v789_v60, %v788_v49  ;;  %v732_v13 = vrot.slane %v705_v58, 4 }
  0xd0   : > { %v725_v56 = vadd.f32 %v724_v46, %v723_v51  ;;  %v742_v18 = vadd.f32 %v741_v17, %v740_v55  ;;  %v727_v59 = vadd.f32 %v726_v38, %v704_v12  ;;  %v805_v6 = vsel %vm327_vm0, %v773_v53, 0.0  ;;  %v813_v8 = vpop.permute.xlu1 %812  ;;  %v754_v14 = vpop.permute.xlu0 %753 }
  0xd1   : > { %v2434_v29 = vsel %vm974_vm10, %v2396_v24, %v718_v1  ;;  %v791_v50 = vrot.slane %v790_v0, 1  ;;  %v733_v3 = vadd.f32 %v732_v13, %v705_v58  ;;  %v806_v45 = vrot.slane %v805_v6, 4 }
  0xd2   : > { %v977_v15 = vsel %vm974_vm10, %v2390_v47, %v725_v56  ;;  %v743_v44 = vrot.slane %v742_v18, 1  ;;  %v728_v36 = vrot.slane %v727_v59, 2  ;;  %v758_v43 = vsel %vm757_vm11, %v2398_v16, %v748_v10 }
  0xd3   : > { %v792_v49 = vadd.f32 %v791_v50, %v790_v0  ;;  %v734_v40 = vrot.slane %v733_v3, 2  ;;  %v807_v51 = vadd.f32 %v806_v45, %v805_v6  ;;  %v759_v55 = vsel %vm757_vm11, %v748_v10, %v2381_v7 }
  0xd4   : > { %v744_v24 = vadd.f32 %v743_v44, %v742_v18  ;;  %v729_v54 = vadd.f32 %v728_v36, %v727_v59  ;;  %v768_v12 = vmul.f32 %v758_v43, %v2141_v27  ;;  %v769_v5 = vmul.f32 %v759_v55, %v2151_v32  ;;  %v815_v58 = vpop.permute.xlu0 %814  ;;  %v2451_v38 = vpop.permute.xlu1 %822 }
  0xd5   : > { %v2445_v47 = vsel %vm981_vm12, %v977_v15, %v792_v49  ;;  %v735_v2 = vadd.f32 %v734_v40, %v733_v3  ;;  %v808_v60 = vrot.slane %v807_v51, 2  ;;  %v837_v16 = vmul.f32 %v2422_v57, %v2125_v19 }
  0xd6   : > { %v980_v46 = vsel %vm974_vm10, %v2407_v52, %v744_v24  ;;  %v730_v17 = vrot.slane %v729_v54, 1  ;;  %v774_v7 = vrot.slane %v768_v12, 4  ;;  %v780_v10 = vrot.slane %v769_v5, 4 }
  0xd7   : > { %v736_v53 = vrot.slane %v735_v2, 1  ;;  %v809_v1 = vadd.f32 %v808_v60, %v807_v51  ;;  %v853_v0 = vsel %vm327_vm0, %v837_v16, 0.0  ;;  %v760_v13 = vsel %vm757_vm11, %v752_v63, %v754_v14 }
  0xd8   : > { %v731_v56 = vadd.f32 %v730_v17, %v729_v54  ;;  %v775_v18 = vadd.f32 %v774_v7, %v768_v12  ;;  %v781_v59 = vadd.f32 %v780_v10, %v769_v5  ;;  %v854_v6 = vrot.slane %v853_v0, 4  ;;  %v880_v55 = vpop.permute.xlu0 %879  ;;  %v882_v12 = vpop.permute.xlu1 %881 }
  0xd9   : > { %v737_v50 = vadd.f32 %v736_v53, %v735_v2  ;;  %v810_v3 = vrot.slane %v809_v1, 1  ;;  %v761_v52 = vsel %vm757_vm11, %v754_v14, %v2409_v9  ;;  %v771_v45 = vmul.f32 %v760_v13, %v2154_v34 }
  0xda   : > { %v978_v15 = vsel %vm974_vm10, %v2413_v22, %v731_v56  ;;  %v776_v44 = vrot.slane %v775_v18, 2  ;;  %v782_v36 = vrot.slane %v781_v59, 2  ;;  %v855_v43 = vadd.f32 %v854_v6, %v853_v0 }
  0xdb   : > { %v2462_v63 = vsel %vm974_vm10, %v2416_v62, %v737_v50  ;;  %v811_v49 = vadd.f32 %v810_v3, %v809_v1  ;;  %v772_v40 = vmul.f32 %v761_v52, %v2169_v39  ;;  %v793_v51 = vrot.slane %v771_v45, 4 }
  0xdc   : > { %v777_v24 = vadd.f32 %v776_v44, %v775_v18  ;;  %v783_v9 = vadd.f32 %v782_v36, %v781_v59  ;;  %v856_v14 = vrot.slane %v855_v43, 2  ;;  %v840_v54 = vmul.f32 %v2451_v38, %v2143_v28  ;;  %v884_v3 = vpop.permute.xlu0 %883 }
  0xdd   : > { %v987_v22 = vsel %vm981_vm12, %v980_v46, %v811_v49  ;;  %v794_v5 = vadd.f32 %v793_v51, %v771_v45  ;;  %v799_v2 = vrot.slane %v772_v40, 4  ;;  %v825_v60 = vsel %vm824_vm13, %v813_v8, %v815_v58 }
  0xde   : > { %v778_v62 = vrot.slane %v777_v24, 1  ;;  %v784_v16 = vrot.slane %v783_v9, 1  ;;  %v857_v17 = vadd.f32 %v856_v14, %v855_v43  ;;  %v872_v7 = vsel %vm327_vm0, %v840_v54, 0.0 }
  0xdf   : > { %v795_v10 = vrot.slane %v794_v5, 2  ;;  %v800_v53 = vadd.f32 %v799_v2, %v772_v40  ;;  %v873_v1 = vrot.slane %v872_v7, 4  ;;  %v826_v0 = vsel %vm824_vm13, %v815_v58, %v2422_v57  ;;  %v819_v57 = vpop.permute.xlu1 %818 }
  0xe0   : > { %v779_v13 = vadd.f32 %v778_v62, %v777_v24  ;;  %v785_v56 = vadd.f32 %v784_v16, %v783_v9  ;;  %v858_v18 = vrot.slane %v857_v17, 1  ;;  %v835_v46 = vmul.f32 %v825_v60, %v2141_v27 }
  0xe1   : > { %v796_v59 = vadd.f32 %v795_v10, %v794_v5  ;;  %v801_v6 = vrot.slane %v800_v53, 2  ;;  %v874_v50 = vadd.f32 %v873_v1, %v872_v7  ;;  %v836_v8 = vmul.f32 %v826_v0, %v2151_v32 }
  0xe2   : > { %v982_v52 = vsel %vm981_vm12, %v2429_v4, %v779_v13  ;;  %v983_v45 = vsel %vm981_vm12, %v2434_v29, %v785_v56  ;;  %v859_v44 = vadd.f32 %v858_v18, %v857_v17  ;;  %v841_v36 = vrot.slane %v835_v46, 4  ;;  %v821_v13 = vpop.permute.xlu0 %820 }
  0xe3   : > { %v797_v58 = vrot.slane %v796_v59, 1  ;;  %v802_v43 = vadd.f32 %v801_v6, %v800_v53  ;;  %v875_v49 = vrot.slane %v874_v50, 2  ;;  %v847_v40 = vrot.slane %v836_v8, 4  ;;  %v886_v0 = vpop.permute.xlu1 %885 }
  0xe4   : > { %v991_v51 = vsel %vm988_vm14, %v2445_v47, %v859_v44  ;;  %v842_v24 = vadd.f32 %v841_v36, %v835_v46  ;;  %v892_v9 = vsel %vm891_vm15, %v880_v55, %v882_v12  ;;  %v893_v14 = vsel %vm891_vm15, %v882_v12, %v884_v3 }
  0xe5   : > { %v798_v54 = vadd.f32 %v797_v58, %v796_v59  ;;  %v803_v4 = vrot.slane %v802_v43, 1  ;;  %v876_v5 = vadd.f32 %v875_v49, %v874_v50  ;;  %v848_v2 = vadd.f32 %v847_v40, %v836_v8 }
  0xe6   : > { %v843_v29 = vrot.slane %v842_v24, 2  ;;  %v902_v60 = vmul.f32 %v892_v9, %v2141_v27  ;;  %v903_v62 = vmul.f32 %v893_v14, %v2151_v32  ;;  %v904_v16 = vmul.f32 %v884_v3, %v2125_v19 }
  0xe7   : > { %v804_v17 = vadd.f32 %v803_v4, %v802_v43  ;;  %v2486_v7 = vsel %vm981_vm12, %v978_v15, %v798_v54  ;;  %v877_v47 = vrot.slane %v876_v5, 1  ;;  %v849_v10 = vrot.slane %v848_v2, 2  ;;  %v890_v14 = vpop.permute.xlu1 %889 }
  0xe8   : > { %v844_v55 = vadd.f32 %v843_v29, %v842_v24  ;;  %v908_v53 = vrot.slane %v902_v60, 4  ;;  %v914_v12 = vrot.slane %v903_v62, 4  ;;  %v920_v1 = vsel %vm327_vm0, %v904_v16, 0.0  ;;  %v888_v29 = vpop.permute.xlu0 %887 }
  0xe9   : > { %v2491_v27 = vsel %vm981_vm12, %v2462_v63, %v804_v17  ;;  %v878_v32 = vadd.f32 %v877_v47, %v876_v5  ;;  %v850_v56 = vadd.f32 %v849_v10, %v848_v2  ;;  %v921_v19 = vrot.slane %v920_v1, 4 }
  0xea   : > { %v845_v18 = vrot.slane %v844_v55, 1  ;;  %v909_v46 = vadd.f32 %v908_v53, %v902_v60  ;;  %v915_v15 = vadd.f32 %v914_v12, %v903_v62  ;;  %v2494_v59 = vadd.f32 %v991_v51, %v2258_v35 }
  0xeb   : > { %v994_v6 = vsel %vm988_vm14, %v987_v22, %v878_v32  ;;  %v851_v50 = vrot.slane %v850_v56, 1  ;;  %v922_v8 = vadd.f32 %v921_v19, %v920_v1  ;;  %v827_v3 = vsel %vm824_vm13, %v819_v57, %v821_v13 }
  0xec   : > { %v846_v44 = vadd.f32 %v845_v18, %v844_v55  ;;  %v910_v36 = vrot.slane %v909_v46, 2  ;;  %vm1024_vm5 = vcmask 253952   ;;  %v916_v63 = vrot.slane %v915_v15, 2 }
  0xed   : > { %v1023_v58 = vsel %vm327_vm0, %v2494_v59, -inf  ;;  %v852_v43 = vadd.f32 %v851_v50, %v850_v56  ;;  %v923_v49 = vrot.slane %v922_v8, 2  ;;  %v828_v40 = vsel %vm824_vm13, %v821_v13, %v2451_v38 }
  0xee   : > { %v838_v51 = vmul.f32 %v827_v3, %v2154_v34  ;;  %v989_v22 = vsel %vm988_vm14, %v982_v52, %v846_v44  ;;  %v911_v24 = vadd.f32 %v910_v36, %v909_v46  ;;  %v917_v9 = vadd.f32 %v916_v63, %v915_v15 }
  0xef   : > { %v839_v57 = vmul.f32 %v828_v40, %v2169_v39  ;;  %v990_v54 = vsel %vm988_vm14, %v983_v45, %v852_v43  ;;  %v2507_v4 = vadd.f32 %v989_v22, %v2256_v33  ;;  %v924_v5 = vadd.f32 %v923_v49, %v922_v8 }
  0xf0   : > { %v860_v2 = vrot.slane %v838_v51, 4  ;;  %v912_v60 = vrot.slane %v911_v24, 1  ;;  %v918_v62 = vrot.slane %v917_v9, 1  ;;  %v2510_v38 = vadd.f32 %v990_v54, %v2260_v48 }
  0xf1   : > { %v866_v16 = vrot.slane %v839_v57, 4  ;;  %v925_v52 = vrot.slane %v924_v5, 1  ;;  %v907_v47 = vmul.f32 %v890_v14, %v2143_v28  ;;  %v2514_v10 = vadd.f32 %v994_v6, %v2272_v61 }
  0xf2   : > { %v861_v17 = vadd.f32 %v860_v2, %v838_v51  ;;  %v913_v45 = vadd.f32 %v912_v60, %v911_v24  ;;  %v919_v55 = vadd.f32 %v918_v62, %v917_v9  ;;  %v894_v12 = vsel %vm891_vm15, %v886_v0, %v888_v29 }
  0xf3   : > { %v867_v53 = vadd.f32 %v866_v16, %v839_v57  ;;  %v926_v1 = vadd.f32 %v925_v52, %v924_v5  ;;  %v939_v32 = vsel %vm327_vm0, %v907_v47, 0.0  ;;  %v2520_v56 = vsel %vm327_vm0, %v2514_v10, -inf }
  0xf4   : > { %v862_v13 = vrot.slane %v861_v17, 2  ;;  %v2523_v19 = vadd.f32 %v913_v45, %v2256_v33  ;;  %v2526_v28 = vadd.f32 %v919_v55, %v2260_v48  ;;  %v940_v46 = vrot.slane %v939_v32, 4 }
  0xf5   : > { %v868_v18 = vrot.slane %v867_v53, 2  ;;  %v2529_v15 = vadd.f32 %v926_v1, %v2258_v35  ;;  %v895_v6 = vsel %vm891_vm15, %v888_v29, %v890_v14  ;;  %v905_v50 = vmul.f32 %v894_v12, %v2154_v34 }
  0xf6   : > { %v863_v0 = vadd.f32 %v862_v13, %v861_v17  ;;  %v1007_v8 = vsel %vm946_vm2, %v2523_v19, -inf  ;;  %v1015_v33 = vsel %vm946_vm2, %v2526_v28, -inf  ;;  %v941_v44 = vadd.f32 %v940_v46, %v939_v32 }
  0xf7   : > { %v869_v3 = vadd.f32 %v868_v18, %v867_v53  ;;  %v1008_v48 = vmax.f32 %v2507_v4, %v1007_v8  ;;  %v1016_v36 = vmax.f32 %v2510_v38, %v1015_v33  ;;  %v1025_v35 = vsel %vm1024_vm5, %v2529_v15, -inf }
  0xf8   : > { %v864_v63 = vrot.slane %v863_v0, 1  ;;  %v1026_v43 = vmax.f32 %v1023_v58, %v1025_v35  ;;  %v942_v40 = vrot.slane %v941_v44, 2  ;;  %v906_v34 = vmul.f32 %v895_v6, %v2169_v39 }
  0xf9   : > { %v870_v49 = vrot.slane %v869_v3, 1  ;;  %v1009_v51 = vrot.slane %v1008_v48, 4  ;;  %v1017_v22 = vrot.slane %v1016_v36, 4  ;;  %v927_v9 = vrot.slane %v905_v50, 4 }
  0xfa   : > { %v865_v24 = vadd.f32 %v864_v63, %v863_v0  ;;  %v1027_v57 = vrot.slane %v1026_v43, 4  ;;  %v943_v54 = vadd.f32 %v942_v40, %v941_v44  ;;  %v933_v5 = vrot.slane %v906_v34, 4  ;;  %v2552_v0 = vpop.permute.xlu1 %1799 }
  0xfb   : > { %v871_v14 = vadd.f32 %v870_v49, %v869_v3  ;;  %v1010_v2 = vmax.f32 %v1008_v48, %v1009_v51  ;;  %v1018_v29 = vmax.f32 %v1016_v36, %v1017_v22  ;;  %v928_v62 = vadd.f32 %v927_v9, %v905_v50 }
  0xfc   : > { %v992_v60 = vsel %vm988_vm14, %v2486_v7, %v865_v24  ;;  %v1028_v16 = vmax.f32 %v1026_v43, %v1027_v57  ;;  %v944_v52 = vrot.slane %v943_v54, 1  ;;  %v934_v39 = vadd.f32 %v933_v5, %v906_v34  ;;  %v1795_v57 = vpop.permute.xlu0 %1794 }
  0xfd   : > { %v993_v58 = vsel %vm988_vm14, %v2491_v27, %v871_v14  ;;  %v1011_v17 = vrot.slane %v1010_v2, 2  ;;  %v1019_v47 = vrot.slane %v1018_v29, 2  ;;  %v929_v45 = vrot.slane %v928_v62, 2 }
  0xfe   : > { %v2547_v55 = vadd.f32 %v992_v60, %v2275_v11  ;;  %v1029_v53 = vrot.slane %v1028_v16, 2  ;;  %v945_v12 = vadd.f32 %v944_v52, %v943_v54  ;;  %v935_v1 = vrot.slane %v934_v39, 2 }
  0xff   : > { %v2550_v13 = vadd.f32 %v993_v58, %v2282_v37  ;;  %v1012_v7 = vmax.f32 %v1010_v2, %v1011_v17  ;;  %v1020_v32 = vmax.f32 %v1018_v29, %v1019_v47  ;;  %v930_v18 = vadd.f32 %v929_v45, %v928_v62  ;;  %v1810_v47 = vpop.permute.xlu1 %1809 }
 0x100   : > { %v1160_v46 = vlaneseq  ;;  %v1030_v27 = vmax.f32 %v1028_v16, %v1029_v53  ;;  %v2555_v6 = vadd.f32 %v945_v12, %v2272_v61  ;;  %v936_v50 = vadd.f32 %v935_v1, %v934_v39  ;;  %v2588_v53 = vpop.permute.xlu0 %1804 }
 0x101   : > { %v1802_v8 = vunpack.i.h.bf16 %v2552_v0  ;;  %v1013_v33 = vrot.slane %v1012_v7, 1  ;;  %v1021_v3 = vrot.slane %v1020_v32, 1  ;;  %v931_v44 = vrot.slane %v930_v18, 1 }
 0x102   : > { %v2558_v48 = vshrl.u32 %v1160_v46, 7  ;;  %v1031_v36 = vrot.slane %v1030_v27, 1  ;;  %v1050_v35 = vsel %vm1024_vm5, %v2555_v6, -inf  ;;  %v937_v63 = vrot.slane %v936_v50, 1 }
 0x103   : > { %v1801_v43 = vunpack.i.l.bf16 %v2552_v0  ;;  %v1014_v49 = vmax.f32 %v1012_v7, %v1013_v33  ;;  %v1022_v40 = vmax.f32 %v1020_v32, %v1021_v3  ;;  %v1051_v61 = vmax.f32 %v2520_v56, %v1050_v35  ;;  %v2601_v35 = vpop.permute.xlu1 %1819 }
 0x104   : > { %v932_v34 = vadd.f32 %v931_v44, %v930_v18  ;;  %v1032_v51 = vmax.f32 %v1030_v27, %v1031_v36  ;;  %v938_v22 = vadd.f32 %v937_v63, %v936_v50  ;;  %v2565_v24 = vsub.s32 0, %v2558_v48 }
 0x105   : > { %v2568_v9 = vsub.s32 1, %v2558_v48  ;;  %v1058_v14 = vsub.f32 %v2507_v4, %v1014_v49  ;;  %v1061_v54 = vsub.f32 %v2523_v19, %v1014_v49  ;;  %v1059_v5 = vsub.f32 %v2510_v38, %v1022_v40 }
 0x106   : > { %v1062_v2 = vsub.f32 %v2526_v28, %v1022_v40  ;;  %v1060_v56 = vsub.f32 %v2494_v59, %v1032_v51  ;;  %v1063_v29 = vsub.f32 %v2529_v15, %v1032_v51  ;;  %v1052_v60 = vrot.slane %v1051_v61, 4 }
 0x107   : > { %v2577_v62 = vadd.f32 %v932_v34, %v2275_v11  ;;  %v1070_v16 = vmul.f32 1.442695, %v1058_v14  ;;  %v1076_v58 = vmul.f32 1.442695, %v1061_v54  ;;  %v1072_v52 = vmul.f32 1.442695, %v1059_v5  ;;  %v2610_v14 = vpop.permute.xlu0 %1814 }
 0x108   : > { %v2580_v39 = vadd.f32 %v938_v22, %v2282_v37  ;;  %v1074_v4 = vmul.f32 1.442695, %v1060_v56  ;;  %v1078_v19 = vmul.f32 1.442695, %v1062_v2  ;;  %v1080_v17 = vmul.f32 1.442695, %v1063_v29 }
 0x109   : > { %v1053_v38 = vmax.f32 %v1051_v61, %v1052_v60  ;;  %1913 = vpow2.f32 %v1070_v16  ;;  %v1033_v59 = vsel %vm946_vm2, %v2577_v62, -inf  ;;  %v1797_v11 = vunpack.i.h.bf16 %v1795_v57 }
 0x10a   : > { %v1041_v28 = vsel %vm946_vm2, %v2580_v39, -inf  ;;  %1915 = vpow2.f32 %v1076_v58  ;;  %v1034_v45 = vmax.f32 %v2547_v55, %v1033_v59  ;;  %v1796_v1 = vunpack.i.l.bf16 %v1795_v57 }
 0x10b   : > { %v1054_v15 = vrot.slane %v1053_v38, 2  ;;  %v1042_v37 = vmax.f32 %v2550_v13, %v1041_v28  ;;  %1917 = vpow2.f32 %v1072_v52  ;;  %v2593_v12 = vsel %vm422_vm1, %v1797_v11, %v1801_v43 }
 0x10c   : > { %v2596_v7 = vsub.s32 2, %v2558_v48  ;;  %1919 = vpow2.f32 %v1074_v4  ;;  %v1035_v18 = vrot.slane %v1034_v45, 4  ;;  %v2599_v27 = vsel %vm422_vm1, %v1796_v1, %v1797_v11 }
 0x10d   : > { %v1055_v32 = vmax.f32 %v1053_v38, %v1054_v15  ;;  %v1043_v46 = vrot.slane %v1042_v37, 4  ;;  %1921 = vpow2.f32 %v1078_v19  ;;  %v1812_v50 = vunpack.i.h.bf16 %v1810_v47 }
 0x10e   : > { %v1811_v33 = vunpack.i.l.bf16 %v1810_v47  ;;  %1923 = vpow2.f32 %v1080_v17  ;;  %v1036_v44 = vmax.f32 %v1034_v45, %v1035_v18  ;;  %v1807_v49 = vunpack.i.h.bf16 %v2588_v53 }
 0x10f   : > { %v1056_v3 = vrot.slane %v1055_v32, 1  ;;  %v1044_v36 = vmax.f32 %v1042_v37, %v1043_v46  ;;  %v1806_v40 = vunpack.i.l.bf16 %v2588_v53  ;;  %v1822_v61 = vunpack.i.h.bf16 %v2601_v35 }
 0x110   : > { %v2604_v63 = vsel %vm489_vm3, %v1811_v33, %v1812_v50  ;;  %v1037_v51 = vrot.slane %v1036_v44, 2  ;;  %v1821_v57 = vunpack.i.l.bf16 %v2601_v35  ;;  %v1817_v2 = vunpack.i.h.bf16 %v2610_v14 }
 0x111   : > { %v1057_v34 = vmax.f32 %v1055_v32, %v1056_v3  ;;  %v1045_v22 = vrot.slane %v1044_v36, 2  ;;  %v2615_v54 = vsel %vm422_vm1, %v1802_v8, %v1806_v40  ;;  %v2620_v5 = vsel %vm422_vm1, %v1806_v40, %v1807_v49 }
 0x112   : > { %v1816_v56 = vunpack.i.l.bf16 %v2610_v14  ;;  %v1038_v16 = vmax.f32 %v1036_v44, %v1037_v51  ;;  %v2631_v8 = vsel %vm489_vm3, %v1821_v57, %v1822_v61  ;;  %v2634_v4 = vsel %vm489_vm3, %v1817_v2, %v1821_v57 }
 0x113   : > { %v1066_v29 = vsub.f32 %v2514_v10, %v1057_v34  ;;  %v1069_v60 = vsub.f32 %v2555_v6, %v1057_v34  ;;  %v1046_v58 = vmax.f32 %v1044_v36, %v1045_v22  ;;  %v2626_v52 = vpop.eup %1913  ;;  %v2640_v10 = vsub.s32 3, %v2558_v48 }
 0x114   : > { %v1297_v19 = vsel %vm489_vm3, %v1812_v50, %v1816_v56  ;;  %v2642_v6 = vpop.eup %1915  ;;  %v1039_v47 = vrot.slane %v1038_v16, 1  ;;  %v1163_v15 = vrot.slane %v2626_v52, %v2565_v24  ;;  %v1199_v45 = vrot.slane %v2626_v52, %v2568_v9 }
 0x115   : > { %v1086_v17 = vmul.f32 1.442695, %v1066_v29  ;;  %v1092_v38 = vmul.f32 1.442695, %v1069_v60  ;;  %v1047_v59 = vrot.slane %v1046_v58, 1  ;;  %v2644_v28 = vpop.eup %1917  ;;  %v1094_v11 = vsel %vm946_vm2, %v2642_v6, 0.0 }
 0x116   : > { %v1263_v37 = vrot.slane %v2626_v52, %v2596_v7  ;;  %v2654_v1 = vpop.eup %1919  ;;  %v2657_v32 = vadd.f32 %v2626_v52, %v1094_v11  ;;  %v1040_v18 = vmax.f32 %v1038_v16, %v1039_v47  ;;  %v1167_v11 = vrot.slane %v2644_v28, %v2565_v24 }
 0x117   : > { %1925 = vpow2.f32 %v1086_v17  ;;  %v1048_v46 = vmax.f32 %v1046_v58, %v1047_v59  ;;  %v2659_v50 = vpop.eup %1921  ;;  %v1110_v33 = vsel %vm327_vm0, %v2654_v1, 0.0  ;;  %v1171_v3 = vrot.slane %v2654_v1, %v2565_v24 }
 0x118   : > { %1927 = vpow2.f32 %v1092_v38  ;;  %v1207_v44 = vrot.slane %v2654_v1, %v2568_v9  ;;  %v2667_v36 = vpop.eup %1923  ;;  %v1096_v40 = vrot.slane %v2657_v32, 4  ;;  %v1102_v34 = vsel %vm946_vm2, %v2659_v50, 0.0 }
 0x119   : > { %v1064_v51 = vsub.f32 %v2547_v55, %v1040_v18  ;;  %v1065_v22 = vsub.f32 %v2550_v13, %v1048_v46  ;;  %v2675_v57 = vadd.f32 %v2644_v28, %v1102_v34  ;;  %v1111_v2 = vsel %vm1024_vm5, %v2667_v36, 0.0  ;;  %v2685_v55 = vpop.permute.xlu1 %1829 }
 0x11a   : > { %v1067_v29 = vsub.f32 %v2577_v62, %v1040_v18  ;;  %v1068_v60 = vsub.f32 %v2580_v39, %v1048_v46  ;;  %v2681_v16 = vadd.f32 %v1111_v2, %v1110_v33  ;;  %v1186_v38 = vmul.f32 %v1171_v3, %v1156_v25 }
 0x11b   : > { %v1082_v58 = vmul.f32 1.442695, %v1064_v51  ;;  %v1084_v17 = vmul.f32 1.442695, %v1065_v22  ;;  %v1250_v59 = vmul.f32 %v1801_v43, %v1207_v44  ;;  %v1184_v39 = vmul.f32 %v1163_v15, %v1154_v30  ;;  %v1825_v44 = vpop.permute.xlu0 %1824 }
 0x11c   : > { %v1088_v13 = vmul.f32 1.442695, %v1067_v29  ;;  %v1090_v47 = vmul.f32 1.442695, %v1068_v60  ;;  %v1113_v62 = vrot.slane %v2681_v16, 4  ;;  %v1203_v18 = vrot.slane %v2644_v28, %v2568_v9 }
 0x11d   : > { %1929 = vpow2.f32 %v1082_v58  ;;  %v1256_v25 = vadd.f32 %v1250_v59, %v1186_v38  ;;  %v1185_v46 = vmul.f32 %v1167_v11, %v1155_v31  ;;  %v1248_v0 = vmul.f32 %v2599_v27, %v1199_v45 }
 0x11e   : > { %1931 = vpow2.f32 %v1084_v17  ;;  %v1249_v43 = vmul.f32 %v2593_v12, %v1203_v18  ;;  %v1306_v33 = vmul.f32 %v2604_v63, %v1263_v37  ;;  %v1267_v3 = vrot.slane %v2644_v28, %v2596_v7  ;;  %v2711_v63 = vpop.permute.xlu1 %1839 }
 0x11f   : > { %1933 = vpow2.f32 %v1088_v13  ;;  %v1254_v30 = vadd.f32 %v1248_v0, %v1184_v39  ;;  %v1271_v15 = vrot.slane %v2654_v1, %v2596_v7  ;;  %v1832_v34 = vunpack.i.h.bf16 %v2685_v55 }
 0x120   : > { %1935 = vpow2.f32 %v1090_v47  ;;  %v1255_v31 = vadd.f32 %v1249_v43, %v1185_v46  ;;  %v1307_v27 = vmul.f32 %v1297_v19, %v1267_v3  ;;  %v1831_v45 = vunpack.i.l.bf16 %v2685_v55 }
 0x121   : > { %v2706_v23 = vpop.eup %1925  ;;  %v1329_v12 = vrot.slane %v2654_v1, %v2640_v10  ;;  %v1312_v51 = vadd.f32 %v1306_v33, %v1254_v30  ;;  %v1308_v60 = vmul.f32 %v1816_v56, %v1271_v15  ;;  %v1827_v59 = vunpack.i.h.bf16 %v1825_v44  ;;  %v1835_v56 = vpop.permute.xlu0 %1834 }
 0x122   : > { %v2713_v37 = vpop.eup %1927  ;;  %v1183_v22 = vrot.slane %v2706_v23, %v2565_v24  ;;  %v1219_v2 = vrot.slane %v2706_v23, %v2568_v9  ;;  %v1283_v29 = vrot.slane %v2706_v23, %v2596_v7  ;;  %v1313_v58 = vadd.f32 %v1307_v27, %v1255_v31  ;;  %v1850_v43 = vpop.permute.xlu1 %1849 }
 0x123   : > { %v2723_v19 = vsel %vm1024_vm5, %v2713_v37, 0.0  ;;  %v1366_v17 = vmul.f32 %v1831_v45, %v1329_v12  ;;  %v1314_v11 = vadd.f32 %v1308_v60, %v1256_v25  ;;  %v1826_v39 = vunpack.i.l.bf16 %v1825_v44 }
 0x124   : > { %v1189_v38 = vmul.f32 %v1183_v22, %v1159_v42  ;;  %v1253_v13 = vmul.f32 %v1807_v49, %v1219_v2  ;;  %v1311_v47 = vmul.f32 %v1822_v61, %v1283_v29  ;;  %v1321_v18 = vrot.slane %v2626_v52, %v2640_v10 }
 0x125   : > { %v1325_v14 = vrot.slane %v2644_v28, %v2640_v10  ;;  %v1355_v20 = vsel %vm556_vm4, %v1827_v59, %v1831_v45  ;;  %v2739_v42 = vsub.s32 4, %v2558_v48  ;;  %v1842_v53 = vunpack.i.h.bf16 %v2711_v63 }
 0x126   : > { %v1259_v46 = vadd.f32 %v1253_v13, %v1189_v38  ;;  %v2744_v49 = vadd.f32 %v1366_v17, %v1314_v11  ;;  %v1354_v61 = vsel %vm556_vm4, %v1826_v39, %v1827_v59  ;;  %v1841_v0 = vunpack.i.l.bf16 %v2711_v63  ;;  %v1845_v59 = vpop.permute.xlu0 %1844 }
 0x127   : > { %v2742_v35 = vpop.eup %1929  ;;  %v1365_v25 = vmul.f32 %v1355_v20, %v1325_v14  ;;  %v1364_v22 = vmul.f32 %v1354_v61, %v1321_v18  ;;  %v1379_v14 = vrot.slane %v2626_v52, %v2739_v42  ;;  %v1836_v20 = vunpack.i.l.bf16 %v1835_v56 }
 0x128   : > { %v2748_v33 = vpop.eup %1931  ;;  %v1175_v3 = vrot.slane %v2742_v35, %v2565_v24  ;;  %v1211_v44 = vrot.slane %v2742_v35, %v2568_v9  ;;  %v1317_v30 = vadd.f32 %v1311_v47, %v1259_v46  ;;  %v1275_v15 = vrot.slane %v2742_v35, %v2596_v7 }
 0x129   : > { %v2756_v31 = vpop.eup %1933  ;;  %v1179_v27 = vrot.slane %v2748_v33, %v2565_v24  ;;  %v1215_v45 = vrot.slane %v2748_v33, %v2568_v9  ;;  %v1279_v12 = vrot.slane %v2748_v33, %v2596_v7  ;;  %v1370_v39 = vadd.f32 %v1364_v22, %v1312_v51 }
 0x12a   : > { %v2764_v2 = vpop.eup %1935  ;;  %v1119_v29 = vsel %vm946_vm2, %v2756_v31, 0.0  ;;  %v1187_v60 = vmul.f32 %v1175_v3, %v1157_v26  ;;  %v1251_v17 = vmul.f32 %v2615_v54, %v1211_v44  ;;  %v1309_v38 = vmul.f32 %v2634_v4, %v1275_v15  ;;  %v1855_v22 = vpop.permute.xlu0 %1854 }
 0x12b   : > { %v2773_v13 = vadd.f32 %v2742_v35, %v1119_v29  ;;  %v1127_v9 = vsel %vm946_vm2, %v2764_v2, 0.0  ;;  %v1188_v7 = vmul.f32 %v1179_v27, %v1158_v41  ;;  %v1252_v47 = vmul.f32 %v2620_v5, %v1215_v45  ;;  %v2789_v41 = vpop.permute.xlu1 %1859 }
 0x12c   : > { %v2781_v11 = vadd.f32 %v2748_v33, %v1127_v9  ;;  %v1257_v26 = vadd.f32 %v1251_v17, %v1187_v60  ;;  %v1310_v54 = vmul.f32 %v2631_v8, %v1279_v12  ;;  %v1371_v18 = vadd.f32 %v1365_v25, %v1313_v58 }
 0x12d   : > { %v1258_v4 = vadd.f32 %v1252_v47, %v1188_v7  ;;  %v1412_v21 = vsel %vm623_vm7, %v1841_v0, %v1842_v53  ;;  %v1837_v46 = vunpack.i.h.bf16 %v1835_v56  ;;  %v1333_v61 = vrot.slane %v2742_v35, %v2640_v10 }
 0x12e   : > { %v1315_v5 = vadd.f32 %v1309_v38, %v1257_v26  ;;  %v1422_v8 = vmul.f32 %v1412_v21, %v1379_v14  ;;  %v1337_v51 = vrot.slane %v2748_v33, %v2640_v10  ;;  %v1341_v58 = vrot.slane %v2706_v23, %v2640_v10 }
 0x12f   : > { %v1316_v3 = vadd.f32 %v1310_v54, %v1258_v4  ;;  %v1356_v25 = vsel %vm556_vm4, %v1832_v34, %v1836_v20  ;;  %v1357_v0 = vsel %vm556_vm4, %v1836_v20, %v1837_v46  ;;  %v1852_v44 = vunpack.i.h.bf16 %v1850_v43  ;;  %v2806_v7 = vpop.permute.xlu1 %1869 }
 0x130   : > { %v1851_v15 = vunpack.i.l.bf16 %v1850_v43  ;;  %v1428_v56 = vadd.f32 %v1422_v8, %v1370_v39  ;;  %v1367_v27 = vmul.f32 %v1356_v25, %v1333_v61  ;;  %v1368_v45 = vmul.f32 %v1357_v0, %v1337_v51  ;;  %v1865_v51 = vpop.permute.xlu0 %1864 }
 0x131   : > { %v1369_v12 = vmul.f32 %v1837_v46, %v1341_v58  ;;  %v1395_v29 = vrot.slane %v2748_v33, %v2739_v42  ;;  %v1399_v60 = vrot.slane %v2706_v23, %v2739_v42  ;;  %v1847_v55 = vunpack.i.h.bf16 %v1845_v59 }
 0x132   : > { %v1415_v10 = vsel %vm623_vm7, %v1851_v15, %v1852_v44  ;;  %v1373_v17 = vadd.f32 %v1367_v27, %v1315_v5  ;;  %v1374_v34 = vadd.f32 %v1368_v45, %v1316_v3  ;;  %v1846_v9 = vunpack.i.l.bf16 %v1845_v59 }
 0x133   : > { %v1375_v38 = vadd.f32 %v1369_v12, %v1317_v30  ;;  %v1426_v43 = vmul.f32 %v1415_v10, %v1395_v29  ;;  %v1427_v47 = vmul.f32 %v1852_v44, %v1399_v60  ;;  %v1414_v26 = vsel %vm623_vm7, %v1847_v55, %v1851_v15  ;;  %v1880_v27 = vpop.permute.xlu1 %1879 }
 0x134   : > { %v1383_v54 = vrot.slane %v2644_v28, %v2739_v42  ;;  %v1387_v39 = vrot.slane %v2654_v1, %v2739_v42  ;;  %v1391_v4 = vrot.slane %v2742_v35, %v2739_v42  ;;  %v1413_v30 = vsel %vm623_vm7, %v1842_v53, %v1846_v9 }
 0x135   : > { %v1436_v59 = vsub.s32 5, %v2558_v48  ;;  %v1432_v14 = vadd.f32 %v1426_v43, %v1374_v34  ;;  %v1433_v21 = vadd.f32 %v1427_v47, %v1375_v38  ;;  %v1862_v46 = vunpack.i.h.bf16 %v2789_v41 }
 0x136   : > { %v1423_v5 = vmul.f32 %v1413_v30, %v1383_v54  ;;  %v1424_v20 = vmul.f32 %v1846_v9, %v1387_v39  ;;  %v1425_v61 = vmul.f32 %v1414_v26, %v1391_v4  ;;  %v1861_v3 = vunpack.i.l.bf16 %v2789_v41  ;;  %v1875_v26 = vpop.permute.xlu0 %1874 }
 0x137   : > { %v1445_v8 = vrot.slane %v2654_v1, %v1436_v59  ;;  %v1857_v42 = vunpack.i.h.bf16 %v1855_v22  ;;  %v1856_v25 = vunpack.i.l.bf16 %v1855_v22  ;;  %v1437_v63 = vrot.slane %v2626_v52, %v1436_v59 }
 0x138   : > { %v1429_v58 = vadd.f32 %v1423_v5, %v1371_v18  ;;  %v1430_v53 = vadd.f32 %v1424_v20, %v2744_v49  ;;  %v1431_v0 = vadd.f32 %v1425_v61, %v1373_v17  ;;  %v1441_v15 = vrot.slane %v2644_v28, %v1436_v59 }
 0x139   : > { %v1482_v44 = vmul.f32 %v1861_v3, %v1445_v8  ;;  %v1471_v45 = vsel %vm690_vm8, %v1857_v42, %v1861_v3  ;;  %v1470_v12 = vsel %vm690_vm8, %v1856_v25, %v1857_v42  ;;  %v1494_v41 = vsub.s32 6, %v2558_v48  ;;  %v1890_v3 = vpop.permute.xlu1 %1889 }
 0x13a   : > { %v1872_v29 = vunpack.i.h.bf16 %v2806_v7  ;;  %v1480_v60 = vmul.f32 %v1470_v12, %v1437_v63  ;;  %v1481_v22 = vmul.f32 %v1471_v45, %v1441_v15  ;;  %v1871_v10 = vunpack.i.l.bf16 %v2806_v7 }
 0x13b   : > { %v1488_v18 = vadd.f32 %v1482_v44, %v1430_v53  ;;  %v1495_v49 = vrot.slane %v2626_v52, %v1494_v41  ;;  %v1867_v55 = vunpack.i.h.bf16 %v1865_v51  ;;  %v1866_v17 = vunpack.i.l.bf16 %v1865_v51 }
 0x13c   : > { %v1449_v34 = vrot.slane %v2742_v35, %v1436_v59  ;;  %v1486_v38 = vadd.f32 %v1480_v60, %v1428_v56  ;;  %v1487_v9 = vadd.f32 %v1481_v22, %v1429_v58  ;;  %v1528_v43 = vsel %vm757_vm11, %v1871_v10, %v1872_v29  ;;  %v1885_v22 = vpop.permute.xlu0 %1884 }
 0x13d   : > { %v1453_v47 = vrot.slane %v2748_v33, %v1436_v59  ;;  %v1538_v54 = vmul.f32 %v1528_v43, %v1495_v49  ;;  %v1457_v39 = vrot.slane %v2706_v23, %v1436_v59  ;;  %v1472_v4 = vsel %vm690_vm8, %v1862_v46, %v1866_v17 }
 0x13e   : > { %v1473_v7 = vsel %vm690_vm8, %v1866_v17, %v1867_v55  ;;  %v1483_v30 = vmul.f32 %v1472_v4, %v1449_v34  ;;  %v1882_v20 = vunpack.i.h.bf16 %v1880_v27  ;;  %v1881_v61 = vunpack.i.l.bf16 %v1880_v27 }
 0x13f   : > { %v1484_v5 = vmul.f32 %v1473_v7, %v1453_v47  ;;  %v1544_v8 = vadd.f32 %v1538_v54, %v1486_v38  ;;  %v1485_v56 = vmul.f32 %v1867_v55, %v1457_v39  ;;  %v1511_v51 = vrot.slane %v2748_v33, %v1494_v41  ;;  %v2846_v38 = vpop.permute.xlu1 %1899 }
 0x140   : > { %v1515_v58 = vrot.slane %v2706_v23, %v1494_v41  ;;  %v1489_v42 = vadd.f32 %v1483_v30, %v1431_v0  ;;  %v1531_v63 = vsel %vm757_vm11, %v1881_v61, %v1882_v20  ;;  %v1877_v59 = vunpack.i.h.bf16 %v1875_v26 }
 0x141   : > { %v1490_v25 = vadd.f32 %v1484_v5, %v1432_v14  ;;  %v1491_v53 = vadd.f32 %v1485_v56, %v1433_v21  ;;  %v1542_v46 = vmul.f32 %v1531_v63, %v1511_v51  ;;  %v1876_v15 = vunpack.i.l.bf16 %v1875_v26 }
 0x142   : > { %v1543_v44 = vmul.f32 %v1882_v20, %v1515_v58  ;;  %v1530_v45 = vsel %vm757_vm11, %v1877_v59, %v1881_v61  ;;  %v1499_v27 = vrot.slane %v2644_v28, %v1494_v41  ;;  %v1503_v12 = vrot.slane %v2654_v1, %v1494_v41 }
 0x143   : > { %v1507_v60 = vrot.slane %v2742_v35, %v1494_v41  ;;  %v1548_v10 = vadd.f32 %v1542_v46, %v1490_v25  ;;  %v1529_v14 = vsel %vm757_vm11, %v1872_v29, %v1876_v15  ;;  %v1552_v0 = vsub.s32 7, %v2558_v48  ;;  %v1910_v63 = vpop.permute.xlu1 %1909 }
 0x144   : > { %v1549_v49 = vadd.f32 %v1543_v44, %v1491_v53  ;;  %v1539_v55 = vmul.f32 %v1529_v14, %v1499_v27  ;;  %v1540_v21 = vmul.f32 %v1876_v15, %v1503_v12  ;;  %v1892_v34 = vunpack.i.h.bf16 %v1890_v3 }
 0x145   : > { %v1541_v17 = vmul.f32 %v1530_v45, %v1507_v60  ;;  %v1891_v43 = vunpack.i.l.bf16 %v1890_v3  ;;  %v1561_v47 = vrot.slane %v2654_v1, %v1552_v0  ;;  %v1887_v26 = vunpack.i.h.bf16 %v1885_v22 }
 0x146   : > { %v1886_v54 = vunpack.i.l.bf16 %v1885_v22  ;;  %v1545_v39 = vadd.f32 %v1539_v55, %v1487_v9  ;;  %v1546_v41 = vadd.f32 %v1540_v21, %v1488_v18  ;;  %v1553_v7 = vrot.slane %v2626_v52, %v1552_v0  ;;  %v1895_v18 = vpop.permute.xlu0 %1894 }
 0x147   : > { %v1547_v4 = vadd.f32 %v1541_v17, %v1489_v42  ;;  %v1598_v30 = vmul.f32 %v1891_v43, %v1561_v47  ;;  %v1587_v29 = vsel %vm824_vm13, %v1887_v26, %v1891_v43  ;;  %v1557_v48 = vrot.slane %v2644_v28, %v1552_v0 }
 0x148   : > { %v1586_v5 = vsel %vm824_vm13, %v1886_v54, %v1887_v26  ;;  %v1902_v61 = vunpack.i.h.bf16 %v2846_v38  ;;  %v1901_v3 = vunpack.i.l.bf16 %v2846_v38  ;;  %v1097_v1 = vadd.f32 %v1096_v40, %v2657_v32 }
 0x149   : > { %v1596_v20 = vmul.f32 %v1586_v5, %v1553_v7  ;;  %v2858_v9 = vadd.f32 %v1598_v30, %v1546_v41  ;;  %v1597_v52 = vmul.f32 %v1587_v29, %v1557_v48  ;;  %v1611_v56 = vrot.slane %v2642_v6, %v2565_v24 }
 0x14a   : > { %v1897_v51 = vunpack.i.h.bf16 %v1895_v18  ;;  %v1098_v58 = vrot.slane %v1097_v1, 2  ;;  %v1644_v42 = vsel %vm891_vm15, %v1901_v3, %v1902_v61  ;;  %v1896_v25 = vunpack.i.l.bf16 %v1895_v18 }
 0x14b   : > { %v1602_v28 = vadd.f32 %v1596_v20, %v1544_v8  ;;  %v2865_v59 = vadd.f32 %v1597_v52, %v1545_v39  ;;  %v1654_v53 = vmul.f32 %v1644_v42, %v1611_v56  ;;  %v1565_v32 = vrot.slane %v2742_v35, %v1552_v0  ;;  %v1905_v35 = vpop.permute.xlu0 %1904 }
 0x14c   : > { %v1569_v40 = vrot.slane %v2748_v33, %v1552_v0  ;;  %v1099_v46 = vadd.f32 %v1098_v58, %v1097_v1  ;;  %v1573_v44 = vrot.slane %v2706_v23, %v1552_v0  ;;  %v1588_v6 = vsel %vm824_vm13, %v1892_v34, %v1896_v25 }
 0x14d   : > { %v1589_v8 = vsel %vm824_vm13, %v1896_v25, %v1897_v51  ;;  %v2872_v15 = vadd.f32 %v1654_v53, %v1602_v28  ;;  %v1599_v45 = vmul.f32 %v1588_v6, %v1565_v32  ;;  %v1912_v12 = vunpack.i.h.bf16 %v1910_v63 }
 0x14e   : > { %v1600_v27 = vmul.f32 %v1589_v8, %v1569_v40  ;;  %v1100_v60 = vrot.slane %v1099_v46, 1  ;;  %v1601_v22 = vmul.f32 %v1897_v51, %v1573_v44  ;;  %v1911_v14 = vunpack.i.l.bf16 %v1910_v63 }
 0x14f   : > { %v1129_v55 = vrot.slane %v2781_v11, 4  ;;  %v1605_v21 = vadd.f32 %v1599_v45, %v1547_v4  ;;  %v1135_v0 = vsel %vm327_vm0, %v2706_v23, 0.0  ;;  %v1627_v17 = vrot.slane %v2764_v2, %v2565_v24 }
 0x150   : > { %v1606_v33 = vadd.f32 %v1600_v27, %v1548_v10  ;;  %v1101_v34 = vadd.f32 %v1100_v60, %v1099_v46  ;;  %v1607_v43 = vadd.f32 %v1601_v22, %v1549_v49  ;;  %v1137_v26 = vadd.f32 %v2723_v19, %v1135_v0 }
 0x151   : > { %v1130_v47 = vadd.f32 %v1129_v55, %v2781_v11  ;;  %v1631_v54 = vrot.slane %v2713_v37, %v2565_v24  ;;  %v1647_v39 = vsel %vm891_vm15, %v1911_v14, %v1912_v12  ;;  %v1907_v41 = vunpack.i.h.bf16 %v1905_v35 }
 0x152   : > { %v1906_v4 = vunpack.i.l.bf16 %v1905_v35  ;;  %1937 = vrcp.f32 %v1101_v34  ;;  %v1138_v7 = vrot.slane %v1137_v26, 4  ;;  %v1658_v23 = vmul.f32 %v1647_v39, %v1627_v17 }
 0x153   : > { %v1131_v10 = vrot.slane %v1130_v47, 2  ;;  %v1659_v30 = vmul.f32 %v1912_v12, %v1631_v54  ;;  %v1646_v2 = vsel %vm891_vm15, %v1907_v41, %v1911_v14  ;;  %v1104_v49 = vrot.slane %v2675_v57, 4 }
 0x154   : > { %v1114_v19 = vadd.f32 %v1113_v62, %v2681_v16  ;;  %v1139_v37 = vadd.f32 %v1138_v7, %v1137_v26  ;;  %v1664_v29 = vadd.f32 %v1658_v23, %v1606_v33  ;;  %v1121_v48 = vrot.slane %v2773_v13, 4 }
 0x155   : > { %v1132_v11 = vadd.f32 %v1131_v10, %v1130_v47  ;;  %v1665_v5 = vadd.f32 %v1659_v30, %v1607_v43  ;;  %v1105_v20 = vadd.f32 %v1104_v49, %v2675_v57  ;;  %v1615_v1 = vrot.slane %v2659_v50, %v2565_v24 }
 0x156   : > { %v1115_v3 = vrot.slane %v1114_v19, 2  ;;  %v1140_v52 = vrot.slane %v1139_v37, 2  ;;  %v1122_v56 = vadd.f32 %v1121_v48, %v2773_v13  ;;  %v1619_v16 = vrot.slane %v2667_v36, %v2565_v24 }
 0x157   : > { %v1133_v18 = vrot.slane %v1132_v11, 1  ;;  %v1106_v62 = vrot.slane %v1105_v20, 2  ;;  %v1623_v28 = vrot.slane %v2756_v31, %v2565_v24  ;;  %v1645_v57 = vsel %vm891_vm15, %v1902_v61, %v1906_v4 }
 0x158   : > { %v1116_v51 = vadd.f32 %v1115_v3, %v1114_v19  ;;  %v1141_v42 = vadd.f32 %v1140_v52, %v1139_v37  ;;  %v1123_v50 = vrot.slane %v1122_v56, 2  ;;  %v1655_v25 = vmul.f32 %v1645_v57, %v1615_v1 }
 0x159   : > { %v1134_v58 = vadd.f32 %v1133_v18, %v1132_v11  ;;  %v1107_v63 = vadd.f32 %v1106_v62, %v1105_v20  ;;  %v1656_v13 = vmul.f32 %v1906_v4, %v1619_v16  ;;  %v1657_v32 = vmul.f32 %v1646_v2, %v1623_v28 }
 0x15a   : > { %v1117_v53 = vrot.slane %v1116_v51, 1  ;;  %v1142_v40 = vrot.slane %v1141_v42, 1  ;;  %v1124_v36 = vadd.f32 %v1123_v50, %v1122_v56  ;;  %v1661_v46 = vadd.f32 %v1655_v25, %v2865_v59 }
 0x15b   : > { %1939 = vrcp.f32 %v1134_v58  ;;  %v1108_v44 = vrot.slane %v1107_v63, 1  ;;  %v1662_v31 = vadd.f32 %v1656_v13, %v2858_v9  ;;  %v1663_v38 = vadd.f32 %v1657_v32, %v1605_v21 }
 0x15c   : > { %v1118_v24 = vadd.f32 %v1117_v53, %v1116_v51  ;;  %v1938_v61 = vpop.eup %1937  ;;  %v1143_v6 = vadd.f32 %v1142_v40, %v1141_v42  ;;  %v1125_v8 = vrot.slane %v1124_v36, 1 }
 0x15d   : > { %v1666_v45 = vmul.f32 %v1938_v61, %v2872_v15  ;;  %v1109_v27 = vadd.f32 %v1108_v44, %v1107_v63 }
 0x15e   : > { %1941 = vrcp.f32 %v1118_v24  ;;  %v1126_v12 = vadd.f32 %v1125_v8, %v1124_v36 }
 0x15f   : > { %1943 = vrcp.f32 %v1143_v6  ;;  %1672 = vst [vmem:[%s281_s30] sm:$0xff] %v1666_v45 }
 0x160   : > { %1945 = vrcp.f32 %v1109_v27 }
 0x161   : > { %1947 = vrcp.f32 %v1126_v12 }
 0x165   : > { %v1940_v59 = vpop.eup %1939 }
 0x166   : > { %v1670_v60 = vmul.f32 %v1940_v59, %v1664_v29 }
 0x168   : > { %v1942_v9 = vpop.eup %1941  ;;  %1676 = vst [vmem:[%s281_s30 + $0x20] sm:$0xff] %v1670_v60 }
 0x169   : > { %v1944_v22 = vpop.eup %1943  ;;  %v1668_v14 = vmul.f32 %v1942_v9, %v1662_v31 }
 0x16a   : > { %v1946_v55 = vpop.eup %1945  ;;  %v1671_v35 = vmul.f32 %v1944_v22, %v1665_v5 }
 0x16b   : > { %v1948_v21 = vpop.eup %1947  ;;  %v1667_v33 = vmul.f32 %v1946_v55, %v1661_v46  ;;  %1674 = vst.msk [vmem:[%s281_s30 + $0x10] sm:$0xff] %vm327_vm0, %v1668_v14 }
 0x16c   : > { %v1669_v0 = vmul.f32 %v1948_v21, %v1663_v38  ;;  %1677 = vst.msk [vmem:[%s281_s30 + $0x28] sm:$0xff] %vm327_vm0, %v1671_v35 }
 0x16d   : > { %1673 = vst [vmem:[%s281_s30 + $0x8] sm:$0xff] %v1667_v33 }
 0x16e   : > { %1675 = vst [vmem:[%s281_s30 + $0x18] sm:$0xff] %v1669_v0 }
 0x16f PF: > { %s15_s18 = sadd.s32 1, %s1955_s18  }
 0x170   : > { %p12_p4 = scmp.ge.s32.totalorder %s15_s18, 6  }
 0x172   :  { %14 = sbr.rel (!%p12_p4) target bundleno = 1 (0x1), region = 76 }

</bundles_post_ra>
